<compile_context>
chip_gen: v5e
topology: v5e:2x2
jax: 0.10.0
libtpu: 0.0.40
codegen_flags: <defaults>
</compile_context>

<pallas_src>
import jax
import jax.numpy as jnp
from jax import lax
from jax.experimental import pallas as pl
from jax.experimental.pallas import tpu as pltpu

HIDDEN_SIZE = 64
INPUT_SIZE = 1
OUTPUT_SIZE = 1

_LANE = 128
_SUBLANE = 8

# PyTorch gate order is (i, f, g, o); repack to (i, f, o, g) and pre-scale the
# g-gate pre-activation by 2 so tanh(z) can be computed as 2*sigmoid(2z) - 1.
_GATE_REORDER = ((0, 1.0), (1, 1.0), (3, 1.0), (2, 2.0))


def _round_up(n, m):
    return ((n + m - 1) // m) * m


def _make_lstm_fc_kernel(hidden, t_real, t_chunk, n_chunks, unroll):
    """Build the kernel body (all sizes are trace-time Python constants)."""
    H = hidden
    G = 4 * H

    def kernel(xt_ref, wih_t_ref, whh_t_ref, b_ref, wfc_t_ref, bfc_ref,
               out_ref, gx_ref):
        # xt_ref   : (T_pad, Bt)       f32  time-major input (input_size==1)
        # wih_t_ref: (1, 4H)           f32  compact W_ih^T (g-gate pre-scaled)
        # whh_t_ref: (H, 4H)           f32/bf16  compact W_hh^T
        # b_ref    : (1, 4H)           f32  compact (b_ih + b_hh)
        # wfc_t_ref: (H, Op)           f32  padded W_fc^T
        # bfc_ref  : (1, Op)           f32  padded b_fc
        # out_ref  : (Bt, Op)          f32  fc(c_n)  (real values in column 0)
        # gx_ref   : (t_chunk, Bt, 4H) f32  scratch: hoisted input projection
        Bt = xt_ref.shape[1]

        # Loop-invariant operands, loaded once.
        whh_t = whh_t_ref[...]                       # (H, G) recurrent weights
        wih3 = wih_t_ref[...].reshape(1, 1, G)
        b3 = b_ref[...].reshape(1, 1, G)
        # TODO(synk): pin whh_t in MXU weight registers via
        # pltpu.matmul_push_rhs / matmul_acc_lhs / matmul_pop if the Mosaic
        # dump shows jnp.dot re-pushing the RHS every time step.

        def fill_gx(start):
            # Input projection + fused bias for one chunk of steps; no
            # dependence on h/c, so it sits off the serial critical path.
            xc = xt_ref[pl.ds(start, t_chunk), :]            # (Tc, Bt)
            gx_ref[...] = xc[:, :, None] * wih3 + b3         # (Tc, Bt, G)

        def step(t, carry):
            # `t` indexes within the current gx chunk.
            h, c = carry
            gates = gx_ref[t] + jnp.dot(h.astype(whh_t.dtype), whh_t,
                                        preferred_element_type=jnp.float32)
            # Compact gate order (i, f, o, g); g pre-activation was scaled by 2
            # at pack time, so a single sigmoid over all 4H lanes serves every
            # gate and g = 2*sigmoid(2z) - 1 == tanh(z).
            s = jax.nn.sigmoid(gates)
            i_g = s[:, 0 * H:1 * H]
            f_g = s[:, 1 * H:2 * H]
            o_g = s[:, 2 * H:3 * H]
            g_g = 2.0 * s[:, 3 * H:4 * H] - 1.0
            c_new = f_g * c + i_g * g_g
            h_new = o_g * jnp.tanh(c_new)
            return (h_new, c_new)

        h = jnp.zeros((Bt, H), jnp.float32)
        c = jnp.zeros((Bt, H), jnp.float32)

        if n_chunks == 1:
            fill_gx(0)
            h, c = lax.fori_loop(0, t_real, step, (h, c), unroll=unroll)
        else:
            def chunk_body(ci, carry):
                base = ci * t_chunk
                fill_gx(pl.multiple_of(base, _SUBLANE))

                def guarded_step(t, inner):
                    h_in, c_in = inner
                    h_new, c_new = step(t, (h_in, c_in))
                    valid = base + t < t_real        # mask padded tail steps
                    return (jnp.where(valid, h_new, h_in),
                            jnp.where(valid, c_new, c_in))

                return lax.fori_loop(0, t_chunk, guarded_step, carry,
                                     unroll=unroll)

            h, c = lax.fori_loop(0, n_chunks, chunk_body, (h, c))
            # TODO(synk): double-buffer gx (2 chunks) so the next chunk's fill
            # overlaps the current chunk's recurrence.

        # PyTorch quirk: h[-1] of `_, h = lstm(x)` is c_n, so fc is applied to
        # the final cell state.
        out_ref[...] = (jnp.dot(c, wfc_t_ref[...],
                                preferred_element_type=jnp.float32)
                        + bfc_ref[...])

    return kernel


def _pack_gate_weight_t(w, hidden):
    """(4H, K) PyTorch gate-major weight -> (K, 4H) transposed, compact gate
    order (i, f, o, g), with the g-gate block pre-scaled by 2."""
    blocks = []
    for old_g, scale in _GATE_REORDER:
        blk = w[old_g * hidden:(old_g + 1) * hidden, :].T.astype(jnp.float32)
        blocks.append(scale * blk)
    return jnp.concatenate(blocks, axis=1)


def _pack_gate_bias(b, hidden):
    parts = []
    for old_g, scale in _GATE_REORDER:
        parts.append(scale *
                     b[old_g * hidden:(old_g + 1) * hidden].astype(jnp.float32))
    return jnp.concatenate(parts).reshape(1, 4 * hidden)


def init_params(key, input_size=INPUT_SIZE, hidden_size=HIDDEN_SIZE,
                output_size=OUTPUT_SIZE):
    """Deterministic init mimicking PyTorch's U(-1/sqrt(H), 1/sqrt(H))."""
    ks = jax.random.split(key, 6)
    k_lstm = 1.0 / jnp.sqrt(hidden_size)
    k_fc = 1.0 / jnp.sqrt(hidden_size)
    w_ih = jax.random.uniform(ks[0], (4 * hidden_size, input_size),
                              jnp.float32, -k_lstm, k_lstm)
    w_hh = jax.random.uniform(ks[1], (4 * hidden_size, hidden_size),
                              jnp.float32, -k_lstm, k_lstm)
    b_ih = jax.random.uniform(ks[2], (4 * hidden_size,),
                              jnp.float32, -k_lstm, k_lstm)
    b_hh = jax.random.uniform(ks[3], (4 * hidden_size,),
                              jnp.float32, -k_lstm, k_lstm)
    w_fc = jax.random.uniform(ks[4], (output_size, hidden_size),
                              jnp.float32, -k_fc, k_fc)
    b_fc = jax.random.uniform(ks[5], (output_size,),
                              jnp.float32, -k_fc, k_fc)
    return dict(w_ih=w_ih, w_hh=w_hh, b_ih=b_ih, b_hh=b_hh,
                w_fc=w_fc, b_fc=b_fc)


def lstm_model_forward(x, params, *, b_tile_max=None, use_bf16_matmul=False,
                       gx_budget_bytes=8 * 1024 * 1024, unroll_max=8):
    """x: (B, T, input_size=1) f32, batch_first.  Returns (1, B, output_size)."""
    B, T, I = x.shape
    assert I == 1, "input_size is 1 in this module"
    H = params["w_hh"].shape[1]
    O = params["w_fc"].shape[0]
    G = 4 * H
    Op = _round_up(O, _LANE)          # lane-dense fc output block

    # Best-effort hardware query (VMEM: 128 MiB on v5e/v6e, 64 MiB/TC on v7x).
    try:
        vmem_cap = int(getattr(pltpu.get_tpu_info(), "vmem_capacity_bytes",
                               64 * 1024 * 1024))
    except Exception:  # no TPU info available -> conservative default
        vmem_cap = 64 * 1024 * 1024

    if b_tile_max is None:
        # Smaller batch tiles on 64 MiB parts (v7x) so >=2 tiles exist and both
        # TensorCores get work through the "parallel" grid axis.
        b_tile_max = 256 if vmem_cap >= 100 * 1024 * 1024 else 128

    # Batch padding / tiling: sublane fill, then "parallel" grid over B-tiles.
    B_pad = _round_up(B, _SUBLANE)
    if B_pad <= b_tile_max:
        bt = B_pad
    else:
        bt = b_tile_max
        B_pad = _round_up(B_pad, bt)
    grid = (B_pad // bt,)

    # gx chunking: keep the hoisted input-projection scratch <= gx_budget_bytes.
    bytes_per_step = bt * G * 4
    steps_in_budget = max(1, gx_budget_bytes // bytes_per_step)
    t_chunk_cap = max(_SUBLANE, (steps_in_budget // _SUBLANE) * _SUBLANE)
    T_pad8 = _round_up(T, _SUBLANE)
    if T_pad8 <= t_chunk_cap:
        t_chunk, n_chunks = T_pad8, 1
    else:
        t_chunk = t_chunk_cap
        n_chunks = (T + t_chunk - 1) // t_chunk
    T_pad = n_chunks * t_chunk        # zero-padded rows; masked in the kernel

    unroll = T if (n_chunks == 1 and T <= unroll_max) else unroll_max

    # Time-major input (time on sublanes, batch on lanes), zero-padded.
    xt = jnp.transpose(x.reshape(B, T).astype(jnp.float32))          # (T, B)
    xt = jnp.pad(xt, ((0, T_pad - T), (0, B_pad - B)))               # (T_pad, B_pad)

    # Weights: compact (i, f, o, g) gate layout, g-gate pre-scaled by 2.
    wih_t = _pack_gate_weight_t(params["w_ih"], H)                   # (1, G)
    whh_t = _pack_gate_weight_t(params["w_hh"], H)                   # (H, G)
    bias = _pack_gate_bias(params["b_ih"] + params["b_hh"], H)       # (1, G)
    if use_bf16_matmul:
        whh_t = whh_t.astype(jnp.bfloat16)   # opt-in: shifts numerics ~bf16 eps
    wfc_t = jnp.zeros((H, Op), jnp.float32).at[:, :O].set(
        params["w_fc"].T.astype(jnp.float32))                        # (H, Op)
    bfc = jnp.zeros((1, Op), jnp.float32).at[0, :O].set(
        params["b_fc"].astype(jnp.float32))                          # (1, Op)

    # Explicit VMEM budget: gx scratch + double-buffered blocks + weights,
    # +25% headroom; never below ~the scoped default, never above physical.
    gx_bytes = t_chunk * bt * G * 4
    xt_blk = T_pad * _round_up(bt, _LANE) * 4
    out_blk = bt * Op * 4
    w_bytes = (G + H * G + G + H * Op + Op) * 4
    need = gx_bytes + 2 * (xt_blk + out_blk + w_bytes)
    vmem_limit = int(min(max(need * 1.25 + (2 << 20), 32 << 20),
                         max(vmem_cap - (2 << 20), 32 << 20)))

    kernel = _make_lstm_fc_kernel(hidden=H, t_real=T, t_chunk=t_chunk,
                                  n_chunks=n_chunks, unroll=unroll)

    out = pl.pallas_call(
        kernel,
        out_shape=jax.ShapeDtypeStruct((B_pad, Op), jnp.float32),
        grid_spec=pltpu.PrefetchScalarGridSpec(
            num_scalar_prefetch=0,
            grid=grid,
            in_specs=[
                pl.BlockSpec((T_pad, bt), lambda i: (0, i)),      # xt
                pl.BlockSpec((1, G), lambda i: (0, 0)),           # wih_t
                pl.BlockSpec((H, G), lambda i: (0, 0)),           # whh_t
                pl.BlockSpec((1, G), lambda i: (0, 0)),           # bias
                pl.BlockSpec((H, Op), lambda i: (0, 0)),          # wfc_t
                pl.BlockSpec((1, Op), lambda i: (0, 0)),          # bfc
            ],
            out_specs=pl.BlockSpec((bt, Op), lambda i: (i, 0)),
            scratch_shapes=[pltpu.VMEM((t_chunk, bt, G), jnp.float32)],
        ),
        compiler_params=pltpu.CompilerParams(
            dimension_semantics=("parallel",),
            vmem_limit_bytes=vmem_limit,
        ),
    )(xt, wih_t, whh_t, bias, wfc_t, bfc)

    # PyTorch output shape: fc(h[-1]) with h[-1] = c_n of shape (1, B, H).
    return out[:B, :O].reshape(1, B, O)


def lstm_model_ref(x, params):
    """Pure-JAX reference of the same forward pass (for sanity checking)."""
    B, T, _ = x.shape
    H = params["w_hh"].shape[1]
    wih_t = params["w_ih"].T
    whh_t = params["w_hh"].T
    b = params["b_ih"] + params["b_hh"]

    def step(carry, x_t):
        h, c = carry
        gates = x_t @ wih_t + h @ whh_t + b
        i = jax.nn.sigmoid(gates[:, :H])
        f = jax.nn.sigmoid(gates[:, H:2 * H])
        g = jnp.tanh(gates[:, 2 * H:3 * H])
        o = jax.nn.sigmoid(gates[:, 3 * H:])
        c_new = f * c + i * g
        h_new = o * jnp.tanh(c_new)
        return (h_new, c_new), None

    h0 = jnp.zeros((B, H), jnp.float32)
    c0 = jnp.zeros((B, H), jnp.float32)
    (h_n, c_n), _ = lax.scan(step, (h0, c0), jnp.transpose(x, (1, 0, 2)))
    out = c_n @ params["w_fc"].T + params["b_fc"]
    return out.reshape(1, B, -1)


if __name__ == "__main__":
    key = jax.random.PRNGKey(0)
    k_param, k_x = jax.random.split(key)

    B, T = 2, 8
    params = init_params(k_param)
    x = jax.random.normal(k_x, (B, T, INPUT_SIZE), jnp.float32)

    out = lstm_model_forward(x, params)
    out = jax.block_until_ready(out)

    ref = lstm_model_ref(x, params)
    assert out.shape == (1, B, OUTPUT_SIZE), out.shape
    assert jnp.allclose(out, ref, atol=5e-5, rtol=1e-5), (out, ref)

    print("KERNEL_OK")
</pallas_src>

<mosaic_0001>
module attributes {stable_mosaic.version = 11 : i64} {
  func.func @kernel(%arg0: i32, %arg1: memref<8x8xf32, #tpu.memory_space<vmem>>, %arg2: memref<1x256xf32, #tpu.memory_space<vmem>>, %arg3: memref<64x256xf32, #tpu.memory_space<vmem>>, %arg4: memref<1x256xf32, #tpu.memory_space<vmem>>, %arg5: memref<64x128xf32, #tpu.memory_space<vmem>>, %arg6: memref<1x128xf32, #tpu.memory_space<vmem>>, %arg7: memref<8x128xf32, #tpu.memory_space<vmem>>, %arg8: memref<8x8x256xf32, #tpu.memory_space<vmem>>) attributes {dimension_semantics = [#tpu.dimension_semantics<parallel>], iteration_bounds = array<i64: 1>, scalar_prefetch = 0 : i64, scratch_operands = 1 : i64, tpu.core_type = #tpu.core_type<tc>, window_params = [{transform_indices = @transform_0, window_bounds = array<i64: 8, 8>}, {pipeline_mode = #tpu.pipeline_mode<synchronous>, transform_indices = @transform_1, window_bounds = array<i64: 1, 256>}, {pipeline_mode = #tpu.pipeline_mode<synchronous>, transform_indices = @transform_2, window_bounds = array<i64: 64, 256>}, {pipeline_mode = #tpu.pipeline_mode<synchronous>, transform_indices = @transform_3, window_bounds = array<i64: 1, 256>}, {pipeline_mode = #tpu.pipeline_mode<synchronous>, transform_indices = @transform_4, window_bounds = array<i64: 64, 128>}, {pipeline_mode = #tpu.pipeline_mode<synchronous>, transform_indices = @transform_5, window_bounds = array<i64: 1, 128>}, {transform_indices = @transform_6, window_bounds = array<i64: 8, 128>}]} {
    %c0 = arith.constant 0 : index
    %c0_0 = arith.constant 0 : index
    %0 = vector.load %arg3[%c0, %c0_0] : memref<64x256xf32, #tpu.memory_space<vmem>>, vector<64x256xf32>
    %c0_1 = arith.constant 0 : index
    %c0_2 = arith.constant 0 : index
    %1 = vector.load %arg2[%c0_1, %c0_2] : memref<1x256xf32, #tpu.memory_space<vmem>>, vector<1x256xf32>
    %2 = vector.shape_cast %1 : vector<1x256xf32> to vector<1x1x256xf32>
    %c0_3 = arith.constant 0 : index
    %c0_4 = arith.constant 0 : index
    %3 = vector.load %arg4[%c0_3, %c0_4] : memref<1x256xf32, #tpu.memory_space<vmem>>, vector<1x256xf32>
    %4 = vector.shape_cast %3 : vector<1x256xf32> to vector<1x1x256xf32>
    %cst = arith.constant 0.000000e+00 : f32
    %5 = vector.broadcast %cst : f32 to vector<8x64xf32>
    %cst_5 = arith.constant 0.000000e+00 : f32
    %6 = vector.broadcast %cst_5 : f32 to vector<8x64xf32>
    %c0_6 = arith.constant 0 : index
    %c0_7 = arith.constant 0 : index
    %7 = vector.load %arg1[%c0_6, %c0_7] : memref<8x8xf32, #tpu.memory_space<vmem>>, vector<8x8xf32>
    %8 = vector.shape_cast %7 : vector<8x8xf32> to vector<8x8x1xf32>
    %9 = vector.broadcast %8 : vector<8x8x1xf32> to vector<8x8x256xf32>
    %10 = vector.broadcast %2 : vector<1x1x256xf32> to vector<8x8x256xf32>
    %11 = arith.mulf %9, %10 : vector<8x8x256xf32>
    %12 = vector.broadcast %4 : vector<1x1x256xf32> to vector<8x8x256xf32>
    %13 = arith.addf %11, %12 : vector<8x8x256xf32>
    %c0_8 = arith.constant 0 : index
    %c0_9 = arith.constant 0 : index
    %c0_10 = arith.constant 0 : index
    %14 = vector.load %arg8[%c0_8, %c0_9, %c0_10] : memref<8x8x256xf32, #tpu.memory_space<vmem>>, vector<8x8x256xf32>
    tpu.vector_store %arg8[%c0_8, %c0_9, %c0_10], %13 {strides = array<i32>} : memref<8x8x256xf32, #tpu.memory_space<vmem>>, vector<8x8x256xf32>,
    %c0_i32 = arith.constant 0 : i32
    %15 = arith.index_cast %c0_i32 : i32 to index
    %c0_11 = arith.constant 0 : index
    %c0_12 = arith.constant 0 : index
    %16 = vector.load %arg8[%15, %c0_11, %c0_12] : memref<8x8x256xf32, #tpu.memory_space<vmem>>, vector<1x8x256xf32>
    %17 = vector.shape_cast %16 : vector<1x8x256xf32> to vector<8x256xf32>
    %cst_13 = arith.constant dense<0.000000e+00> : vector<8x256xf32>
    %18 = tpu.matmul %5, %0, %cst_13 {dimension_numbers = #tpu.dot_dimension_numbers<[1], [0], [0], [1], [0, 0, 1, 1], [], []>} : vector<8x64xf32>, vector<64x256xf32>, vector<8x256xf32> -> vector<8x256xf32>
    %19 = arith.addf %17, %18 : vector<8x256xf32>
    %20 = arith.negf %19 : vector<8x256xf32>
    %21 = math.exp %20 : vector<8x256xf32>
    %cst_14 = arith.constant 1.000000e+00 : f32
    %22 = vector.broadcast %cst_14 : f32 to vector<8x256xf32>
    %23 = arith.addf %22, %21 : vector<8x256xf32>
    %24 = arith.divf %22, %23 : vector<8x256xf32>
    %25 = vector.extract_strided_slice %24 {offsets = [0, 0], sizes = [8, 64], strides = [1, 1]} : vector<8x256xf32> to vector<8x64xf32>
    %26 = vector.extract_strided_slice %24 {offsets = [0, 64], sizes = [8, 64], strides = [1, 1]} : vector<8x256xf32> to vector<8x64xf32>
    %27 = vector.extract_strided_slice %24 {offsets = [0, 128], sizes = [8, 64], strides = [1, 1]} : vector<8x256xf32> to vector<8x64xf32>
    %28 = vector.extract_strided_slice %24 {offsets = [0, 192], sizes = [8, 64], strides = [1, 1]} : vector<8x256xf32> to vector<8x64xf32>
    %cst_15 = arith.constant 2.000000e+00 : f32
    %29 = vector.broadcast %cst_15 : f32 to vector<8x64xf32>
    %30 = arith.mulf %29, %28 : vector<8x64xf32>
    %cst_16 = arith.constant 1.000000e+00 : f32
    %31 = vector.broadcast %cst_16 : f32 to vector<8x64xf32>
    %32 = arith.subf %30, %31 : vector<8x64xf32>
    %33 = arith.mulf %26, %6 : vector<8x64xf32>
    %34 = arith.mulf %25, %32 : vector<8x64xf32>
    %35 = arith.addf %33, %34 : vector<8x64xf32>
    %36 = math.tanh %35 : vector<8x64xf32>
    %37 = arith.mulf %27, %36 : vector<8x64xf32>
    %c1_i32 = arith.constant 1 : i32
    %38 = arith.index_cast %c1_i32 : i32 to index
    %c0_17 = arith.constant 0 : index
    %c0_18 = arith.constant 0 : index
    %39 = vector.load %arg8[%38, %c0_17, %c0_18] : memref<8x8x256xf32, #tpu.memory_space<vmem>>, vector<1x8x256xf32>
    %40 = vector.shape_cast %39 : vector<1x8x256xf32> to vector<8x256xf32>
    %cst_19 = arith.constant dense<0.000000e+00> : vector<8x256xf32>
    %41 = tpu.matmul %37, %0, %cst_19 {dimension_numbers = #tpu.dot_dimension_numbers<[1], [0], [0], [1], [0, 0, 1, 1], [], []>} : vector<8x64xf32>, vector<64x256xf32>, vector<8x256xf32> -> vector<8x256xf32>
    %42 = arith.addf %40, %41 : vector<8x256xf32>
    %43 = arith.negf %42 : vector<8x256xf32>
    %44 = math.exp %43 : vector<8x256xf32>
    %cst_20 = arith.constant 1.000000e+00 : f32
    %45 = vector.broadcast %cst_20 : f32 to vector<8x256xf32>
    %46 = arith.addf %45, %44 : vector<8x256xf32>
    %47 = arith.divf %45, %46 : vector<8x256xf32>
    %48 = vector.extract_strided_slice %47 {offsets = [0, 0], sizes = [8, 64], strides = [1, 1]} : vector<8x256xf32> to vector<8x64xf32>
    %49 = vector.extract_strided_slice %47 {offsets = [0, 64], sizes = [8, 64], strides = [1, 1]} : vector<8x256xf32> to vector<8x64xf32>
    %50 = vector.extract_strided_slice %47 {offsets = [0, 128], sizes = [8, 64], strides = [1, 1]} : vector<8x256xf32> to vector<8x64xf32>
    %51 = vector.extract_strided_slice %47 {offsets = [0, 192], sizes = [8, 64], strides = [1, 1]} : vector<8x256xf32> to vector<8x64xf32>
    %cst_21 = arith.constant 2.000000e+00 : f32
    %52 = vector.broadcast %cst_21 : f32 to vector<8x64xf32>
    %53 = arith.mulf %52, %51 : vector<8x64xf32>
    %cst_22 = arith.constant 1.000000e+00 : f32
    %54 = vector.broadcast %cst_22 : f32 to vector<8x64xf32>
    %55 = arith.subf %53, %54 : vector<8x64xf32>
    %56 = arith.mulf %49, %35 : vector<8x64xf32>
    %57 = arith.mulf %48, %55 : vector<8x64xf32>
    %58 = arith.addf %56, %57 : vector<8x64xf32>
    %59 = math.tanh %58 : vector<8x64xf32>
    %60 = arith.mulf %50, %59 : vector<8x64xf32>
    %c2_i32 = arith.constant 2 : i32
    %61 = arith.index_cast %c2_i32 : i32 to index
    %c0_23 = arith.constant 0 : index
    %c0_24 = arith.constant 0 : index
    %62 = vector.load %arg8[%61, %c0_23, %c0_24] : memref<8x8x256xf32, #tpu.memory_space<vmem>>, vector<1x8x256xf32>
    %63 = vector.shape_cast %62 : vector<1x8x256xf32> to vector<8x256xf32>
    %cst_25 = arith.constant dense<0.000000e+00> : vector<8x256xf32>
    %64 = tpu.matmul %60, %0, %cst_25 {dimension_numbers = #tpu.dot_dimension_numbers<[1], [0], [0], [1], [0, 0, 1, 1], [], []>} : vector<8x64xf32>, vector<64x256xf32>, vector<8x256xf32> -> vector<8x256xf32>
    %65 = arith.addf %63, %64 : vector<8x256xf32>
    %66 = arith.negf %65 : vector<8x256xf32>
    %67 = math.exp %66 : vector<8x256xf32>
    %cst_26 = arith.constant 1.000000e+00 : f32
    %68 = vector.broadcast %cst_26 : f32 to vector<8x256xf32>
    %69 = arith.addf %68, %67 : vector<8x256xf32>
    %70 = arith.divf %68, %69 : vector<8x256xf32>
    %71 = vector.extract_strided_slice %70 {offsets = [0, 0], sizes = [8, 64], strides = [1, 1]} : vector<8x256xf32> to vector<8x64xf32>
    %72 = vector.extract_strided_slice %70 {offsets = [0, 64], sizes = [8, 64], strides = [1, 1]} : vector<8x256xf32> to vector<8x64xf32>
    %73 = vector.extract_strided_slice %70 {offsets = [0, 128], sizes = [8, 64], strides = [1, 1]} : vector<8x256xf32> to vector<8x64xf32>
    %74 = vector.extract_strided_slice %70 {offsets = [0, 192], sizes = [8, 64], strides = [1, 1]} : vector<8x256xf32> to vector<8x64xf32>
    %cst_27 = arith.constant 2.000000e+00 : f32
    %75 = vector.broadcast %cst_27 : f32 to vector<8x64xf32>
    %76 = arith.mulf %75, %74 : vector<8x64xf32>
    %cst_28 = arith.constant 1.000000e+00 : f32
    %77 = vector.broadcast %cst_28 : f32 to vector<8x64xf32>
    %78 = arith.subf %76, %77 : vector<8x64xf32>
    %79 = arith.mulf %72, %58 : vector<8x64xf32>
    %80 = arith.mulf %71, %78 : vector<8x64xf32>
    %81 = arith.addf %79, %80 : vector<8x64xf32>
    %82 = math.tanh %81 : vector<8x64xf32>
    %83 = arith.mulf %73, %82 : vector<8x64xf32>
    %c3_i32 = arith.constant 3 : i32
    %84 = arith.index_cast %c3_i32 : i32 to index
    %c0_29 = arith.constant 0 : index
    %c0_30 = arith.constant 0 : index
    %85 = vector.load %arg8[%84, %c0_29, %c0_30] : memref<8x8x256xf32, #tpu.memory_space<vmem>>, vector<1x8x256xf32>
    %86 = vector.shape_cast %85 : vector<1x8x256xf32> to vector<8x256xf32>
    %cst_31 = arith.constant dense<0.000000e+00> : vector<8x256xf32>
    %87 = tpu.matmul %83, %0, %cst_31 {dimension_numbers = #tpu.dot_dimension_numbers<[1], [0], [0], [1], [0, 0, 1, 1], [], []>} : vector<8x64xf32>, vector<64x256xf32>, vector<8x256xf32> -> vector<8x256xf32>
    %88 = arith.addf %86, %87 : vector<8x256xf32>
    %89 = arith.negf %88 : vector<8x256xf32>
    %90 = math.exp %89 : vector<8x256xf32>
    %cst_32 = arith.constant 1.000000e+00 : f32
    %91 = vector.broadcast %cst_32 : f32 to vector<8x256xf32>
    %92 = arith.addf %91, %90 : vector<8x256xf32>
    %93 = arith.divf %91, %92 : vector<8x256xf32>
    %94 = vector.extract_strided_slice %93 {offsets = [0, 0], sizes = [8, 64], strides = [1, 1]} : vector<8x256xf32> to vector<8x64xf32>
    %95 = vector.extract_strided_slice %93 {offsets = [0, 64], sizes = [8, 64], strides = [1, 1]} : vector<8x256xf32> to vector<8x64xf32>
    %96 = vector.extract_strided_slice %93 {offsets = [0, 128], sizes = [8, 64], strides = [1, 1]} : vector<8x256xf32> to vector<8x64xf32>
    %97 = vector.extract_strided_slice %93 {offsets = [0, 192], sizes = [8, 64], strides = [1, 1]} : vector<8x256xf32> to vector<8x64xf32>
    %cst_33 = arith.constant 2.000000e+00 : f32
    %98 = vector.broadcast %cst_33 : f32 to vector<8x64xf32>
    %99 = arith.mulf %98, %97 : vector<8x64xf32>
    %cst_34 = arith.constant 1.000000e+00 : f32
    %100 = vector.broadcast %cst_34 : f32 to vector<8x64xf32>
    %101 = arith.subf %99, %100 : vector<8x64xf32>
    %102 = arith.mulf %95, %81 : vector<8x64xf32>
    %103 = arith.mulf %94, %101 : vector<8x64xf32>
    %104 = arith.addf %102, %103 : vector<8x64xf32>
    %105 = math.tanh %104 : vector<8x64xf32>
    %106 = arith.mulf %96, %105 : vector<8x64xf32>
    %c4_i32 = arith.constant 4 : i32
    %107 = arith.index_cast %c4_i32 : i32 to index
    %c0_35 = arith.constant 0 : index
    %c0_36 = arith.constant 0 : index
    %108 = vector.load %arg8[%107, %c0_35, %c0_36] : memref<8x8x256xf32, #tpu.memory_space<vmem>>, vector<1x8x256xf32>
    %109 = vector.shape_cast %108 : vector<1x8x256xf32> to vector<8x256xf32>
    %cst_37 = arith.constant dense<0.000000e+00> : vector<8x256xf32>
    %110 = tpu.matmul %106, %0, %cst_37 {dimension_numbers = #tpu.dot_dimension_numbers<[1], [0], [0], [1], [0, 0, 1, 1], [], []>} : vector<8x64xf32>, vector<64x256xf32>, vector<8x256xf32> -> vector<8x256xf32>
    %111 = arith.addf %109, %110 : vector<8x256xf32>
    %112 = arith.negf %111 : vector<8x256xf32>
    %113 = math.exp %112 : vector<8x256xf32>
    %cst_38 = arith.constant 1.000000e+00 : f32
    %114 = vector.broadcast %cst_38 : f32 to vector<8x256xf32>
    %115 = arith.addf %114, %113 : vector<8x256xf32>
    %116 = arith.divf %114, %115 : vector<8x256xf32>
    %117 = vector.extract_strided_slice %116 {offsets = [0, 0], sizes = [8, 64], strides = [1, 1]} : vector<8x256xf32> to vector<8x64xf32>
    %118 = vector.extract_strided_slice %116 {offsets = [0, 64], sizes = [8, 64], strides = [1, 1]} : vector<8x256xf32> to vector<8x64xf32>
    %119 = vector.extract_strided_slice %116 {offsets = [0, 128], sizes = [8, 64], strides = [1, 1]} : vector<8x256xf32> to vector<8x64xf32>
    %120 = vector.extract_strided_slice %116 {offsets = [0, 192], sizes = [8, 64], strides = [1, 1]} : vector<8x256xf32> to vector<8x64xf32>
    %cst_39 = arith.constant 2.000000e+00 : f32
    %121 = vector.broadcast %cst_39 : f32 to vector<8x64xf32>
    %122 = arith.mulf %121, %120 : vector<8x64xf32>
    %cst_40 = arith.constant 1.000000e+00 : f32
    %123 = vector.broadcast %cst_40 : f32 to vector<8x64xf32>
    %124 = arith.subf %122, %123 : vector<8x64xf32>
    %125 = arith.mulf %118, %104 : vector<8x64xf32>
    %126 = arith.mulf %117, %124 : vector<8x64xf32>
    %127 = arith.addf %125, %126 : vector<8x64xf32>
    %128 = math.tanh %127 : vector<8x64xf32>
    %129 = arith.mulf %119, %128 : vector<8x64xf32>
    %c5_i32 = arith.constant 5 : i32
    %130 = arith.index_cast %c5_i32 : i32 to index
    %c0_41 = arith.constant 0 : index
    %c0_42 = arith.constant 0 : index
    %131 = vector.load %arg8[%130, %c0_41, %c0_42] : memref<8x8x256xf32, #tpu.memory_space<vmem>>, vector<1x8x256xf32>
    %132 = vector.shape_cast %131 : vector<1x8x256xf32> to vector<8x256xf32>
    %cst_43 = arith.constant dense<0.000000e+00> : vector<8x256xf32>
    %133 = tpu.matmul %129, %0, %cst_43 {dimension_numbers = #tpu.dot_dimension_numbers<[1], [0], [0], [1], [0, 0, 1, 1], [], []>} : vector<8x64xf32>, vector<64x256xf32>, vector<8x256xf32> -> vector<8x256xf32>
    %134 = arith.addf %132, %133 : vector<8x256xf32>
    %135 = arith.negf %134 : vector<8x256xf32>
    %136 = math.exp %135 : vector<8x256xf32>
    %cst_44 = arith.constant 1.000000e+00 : f32
    %137 = vector.broadcast %cst_44 : f32 to vector<8x256xf32>
    %138 = arith.addf %137, %136 : vector<8x256xf32>
    %139 = arith.divf %137, %138 : vector<8x256xf32>
    %140 = vector.extract_strided_slice %139 {offsets = [0, 0], sizes = [8, 64], strides = [1, 1]} : vector<8x256xf32> to vector<8x64xf32>
    %141 = vector.extract_strided_slice %139 {offsets = [0, 64], sizes = [8, 64], strides = [1, 1]} : vector<8x256xf32> to vector<8x64xf32>
    %142 = vector.extract_strided_slice %139 {offsets = [0, 128], sizes = [8, 64], strides = [1, 1]} : vector<8x256xf32> to vector<8x64xf32>
    %143 = vector.extract_strided_slice %139 {offsets = [0, 192], sizes = [8, 64], strides = [1, 1]} : vector<8x256xf32> to vector<8x64xf32>
    %cst_45 = arith.constant 2.000000e+00 : f32
    %144 = vector.broadcast %cst_45 : f32 to vector<8x64xf32>
    %145 = arith.mulf %144, %143 : vector<8x64xf32>
    %cst_46 = arith.constant 1.000000e+00 : f32
    %146 = vector.broadcast %cst_46 : f32 to vector<8x64xf32>
    %147 = arith.subf %145, %146 : vector<8x64xf32>
    %148 = arith.mulf %141, %127 : vector<8x64xf32>
    %149 = arith.mulf %140, %147 : vector<8x64xf32>
    %150 = arith.addf %148, %149 : vector<8x64xf32>
    %151 = math.tanh %150 : vector<8x64xf32>
    %152 = arith.mulf %142, %151 : vector<8x64xf32>
    %c6_i32 = arith.constant 6 : i32
    %153 = arith.index_cast %c6_i32 : i32 to index
    %c0_47 = arith.constant 0 : index
    %c0_48 = arith.constant 0 : index
    %154 = vector.load %arg8[%153, %c0_47, %c0_48] : memref<8x8x256xf32, #tpu.memory_space<vmem>>, vector<1x8x256xf32>
    %155 = vector.shape_cast %154 : vector<1x8x256xf32> to vector<8x256xf32>
    %cst_49 = arith.constant dense<0.000000e+00> : vector<8x256xf32>
    %156 = tpu.matmul %152, %0, %cst_49 {dimension_numbers = #tpu.dot_dimension_numbers<[1], [0], [0], [1], [0, 0, 1, 1], [], []>} : vector<8x64xf32>, vector<64x256xf32>, vector<8x256xf32> -> vector<8x256xf32>
    %157 = arith.addf %155, %156 : vector<8x256xf32>
    %158 = arith.negf %157 : vector<8x256xf32>
    %159 = math.exp %158 : vector<8x256xf32>
    %cst_50 = arith.constant 1.000000e+00 : f32
    %160 = vector.broadcast %cst_50 : f32 to vector<8x256xf32>
    %161 = arith.addf %160, %159 : vector<8x256xf32>
    %162 = arith.divf %160, %161 : vector<8x256xf32>
    %163 = vector.extract_strided_slice %162 {offsets = [0, 0], sizes = [8, 64], strides = [1, 1]} : vector<8x256xf32> to vector<8x64xf32>
    %164 = vector.extract_strided_slice %162 {offsets = [0, 64], sizes = [8, 64], strides = [1, 1]} : vector<8x256xf32> to vector<8x64xf32>
    %165 = vector.extract_strided_slice %162 {offsets = [0, 128], sizes = [8, 64], strides = [1, 1]} : vector<8x256xf32> to vector<8x64xf32>
    %166 = vector.extract_strided_slice %162 {offsets = [0, 192], sizes = [8, 64], strides = [1, 1]} : vector<8x256xf32> to vector<8x64xf32>
    %cst_51 = arith.constant 2.000000e+00 : f32
    %167 = vector.broadcast %cst_51 : f32 to vector<8x64xf32>
    %168 = arith.mulf %167, %166 : vector<8x64xf32>
    %cst_52 = arith.constant 1.000000e+00 : f32
    %169 = vector.broadcast %cst_52 : f32 to vector<8x64xf32>
    %170 = arith.subf %168, %169 : vector<8x64xf32>
    %171 = arith.mulf %164, %150 : vector<8x64xf32>
    %172 = arith.mulf %163, %170 : vector<8x64xf32>
    %173 = arith.addf %171, %172 : vector<8x64xf32>
    %174 = math.tanh %173 : vector<8x64xf32>
    %175 = arith.mulf %165, %174 : vector<8x64xf32>
    %c7_i32 = arith.constant 7 : i32
    %176 = arith.index_cast %c7_i32 : i32 to index
    %c0_53 = arith.constant 0 : index
    %c0_54 = arith.constant 0 : index
    %177 = vector.load %arg8[%176, %c0_53, %c0_54] : memref<8x8x256xf32, #tpu.memory_space<vmem>>, vector<1x8x256xf32>
    %178 = vector.shape_cast %177 : vector<1x8x256xf32> to vector<8x256xf32>
    %cst_55 = arith.constant dense<0.000000e+00> : vector<8x256xf32>
    %179 = tpu.matmul %175, %0, %cst_55 {dimension_numbers = #tpu.dot_dimension_numbers<[1], [0], [0], [1], [0, 0, 1, 1], [], []>} : vector<8x64xf32>, vector<64x256xf32>, vector<8x256xf32> -> vector<8x256xf32>
    %180 = arith.addf %178, %179 : vector<8x256xf32>
    %181 = arith.negf %180 : vector<8x256xf32>
    %182 = math.exp %181 : vector<8x256xf32>
    %cst_56 = arith.constant 1.000000e+00 : f32
    %183 = vector.broadcast %cst_56 : f32 to vector<8x256xf32>
    %184 = arith.addf %183, %182 : vector<8x256xf32>
    %185 = arith.divf %183, %184 : vector<8x256xf32>
    %186 = vector.extract_strided_slice %185 {offsets = [0, 0], sizes = [8, 64], strides = [1, 1]} : vector<8x256xf32> to vector<8x64xf32>
    %187 = vector.extract_strided_slice %185 {offsets = [0, 64], sizes = [8, 64], strides = [1, 1]} : vector<8x256xf32> to vector<8x64xf32>
    %188 = vector.extract_strided_slice %185 {offsets = [0, 128], sizes = [8, 64], strides = [1, 1]} : vector<8x256xf32> to vector<8x64xf32>
    %189 = vector.extract_strided_slice %185 {offsets = [0, 192], sizes = [8, 64], strides = [1, 1]} : vector<8x256xf32> to vector<8x64xf32>
    %cst_57 = arith.constant 2.000000e+00 : f32
    %190 = vector.broadcast %cst_57 : f32 to vector<8x64xf32>
    %191 = arith.mulf %190, %189 : vector<8x64xf32>
    %cst_58 = arith.constant 1.000000e+00 : f32
    %192 = vector.broadcast %cst_58 : f32 to vector<8x64xf32>
    %193 = arith.subf %191, %192 : vector<8x64xf32>
    %194 = arith.mulf %187, %173 : vector<8x64xf32>
    %195 = arith.mulf %186, %193 : vector<8x64xf32>
    %196 = arith.addf %194, %195 : vector<8x64xf32>
    %197 = math.tanh %196 : vector<8x64xf32>
    %198 = arith.mulf %188, %197 : vector<8x64xf32>
    %c8_i32 = arith.constant 8 : i32
    %c0_59 = arith.constant 0 : index
    %c0_60 = arith.constant 0 : index
    %199 = vector.load %arg5[%c0_59, %c0_60] : memref<64x128xf32, #tpu.memory_space<vmem>>, vector<64x128xf32>
    %cst_61 = arith.constant dense<0.000000e+00> : vector<8x128xf32>
    %200 = tpu.matmul %196, %199, %cst_61 {dimension_numbers = #tpu.dot_dimension_numbers<[1], [0], [0], [1], [0, 0, 1, 1], [], []>} : vector<8x64xf32>, vector<64x128xf32>, vector<8x128xf32> -> vector<8x128xf32>
    %c0_62 = arith.constant 0 : index
    %c0_63 = arith.constant 0 : index
    %201 = vector.load %arg6[%c0_62, %c0_63] : memref<1x128xf32, #tpu.memory_space<vmem>>, vector<1x128xf32>
    %202 = vector.broadcast %201 : vector<1x128xf32> to vector<8x128xf32>
    %203 = arith.addf %200, %202 : vector<8x128xf32>
    %c0_64 = arith.constant 0 : index
    %c0_65 = arith.constant 0 : index
    %204 = vector.load %arg7[%c0_64, %c0_65] : memref<8x128xf32, #tpu.memory_space<vmem>>, vector<8x128xf32>
    tpu.vector_store %arg7[%c0_64, %c0_65], %203 {strides = array<i32>} : memref<8x128xf32, #tpu.memory_space<vmem>>, vector<8x128xf32>,
    return
  }
  func.func @transform_0(%arg0: i32) -> (i32, i32) {
    %c0_i32 = arith.constant 0 : i32
    %c0_i32_0 = arith.constant 0 : i32
    return %c0_i32, %arg0 : i32, i32
  }
  func.func @transform_1(%arg0: i32) -> (i32, i32) {
    %c0_i32 = arith.constant 0 : i32
    %c0_i32_0 = arith.constant 0 : i32
    %c0_i32_1 = arith.constant 0 : i32
    return %c0_i32, %c0_i32_0 : i32, i32
  }
  func.func @transform_2(%arg0: i32) -> (i32, i32) {
    %c0_i32 = arith.constant 0 : i32
    %c0_i32_0 = arith.constant 0 : i32
    %c0_i32_1 = arith.constant 0 : i32
    return %c0_i32, %c0_i32_0 : i32, i32
  }
  func.func @transform_3(%arg0: i32) -> (i32, i32) {
    %c0_i32 = arith.constant 0 : i32
    %c0_i32_0 = arith.constant 0 : i32
    %c0_i32_1 = arith.constant 0 : i32
    return %c0_i32, %c0_i32_0 : i32, i32
  }
  func.func @transform_4(%arg0: i32) -> (i32, i32) {
    %c0_i32 = arith.constant 0 : i32
    %c0_i32_0 = arith.constant 0 : i32
    %c0_i32_1 = arith.constant 0 : i32
    return %c0_i32, %c0_i32_0 : i32, i32
  }
  func.func @transform_5(%arg0: i32) -> (i32, i32) {
    %c0_i32 = arith.constant 0 : i32
    %c0_i32_0 = arith.constant 0 : i32
    %c0_i32_1 = arith.constant 0 : i32
    return %c0_i32, %c0_i32_0 : i32, i32
  }
  func.func @transform_6(%arg0: i32) -> (i32, i32) {
    %c0_i32 = arith.constant 0 : i32
    %c0_i32_0 = arith.constant 0 : i32
    return %arg0, %c0_i32 : i32, i32
  }
}

</mosaic_0001>

<bundles_post_ra>
// kernel: tpu_custom_call.1
= control target key start
LH: loop header
LB: loop body
LE: loop exit
PB: predicated region body
PF: predicated region fallthrough
CT: control target
= control target key end

     0   :  { %11 = vsyncpa [#allocation4], 0  ;;  %s1711_s0 = inlined_call_operand.hbm [shape: f32[8,8], index: 0, kind: input, shape index: {}]   ;;  %s1712_s1 = inlined_call_operand.hbm [shape: f32[1,256], index: 1, kind: input, shape index: {}]   ;;  %s1713_s2 = inlined_call_operand.hbm [shape: f32[64,256], index: 2, kind: input, shape index: {}]   ;;  %s1714_s3 = inlined_call_operand.vmem [shape: f32[1,256], index: 3, kind: input, shape index: {}]   ;;  %s1715_s4 = inlined_call_operand.hbm [shape: f32[64,128], index: 4, kind: input, shape index: {}]   ;;  %s1716_s5 = inlined_call_operand.vmem [shape: f32[1,128], index: 5, kind: input, shape index: {}]   ;;  %s1717_s6 = inlined_call_operand.hbm [shape: f32[8,128], index: 6, kind: output, shape index: {}]  }
   0x1   :  { %12 = vsyncpa [#allocation7], 0 }
   0x2   :  { %13 = vsyncpa [#allocation10], 0  ;;  %s31_s23 = sshll.u32 %s1712_s1, 4  ;;  %s32_s23 = int_to_ptr.hbm [resolvable:$true] %s31_s23 }
   0x3   :  { %14 = vsyncpa [#allocation5], 0  ;;  %s1368_s24 = smov [#allocation6]   ;;  %s20_s28 = sshll.u32 %s1711_s0, 4  ;;  %s21_s28 = int_to_ptr.hbm [resolvable:$true] %s20_s28 }
   0x4   :  { %s33_s25 = sshll.u32 %s1368_s24, 4  ;;  %s1369_s29 = smov [#allocation3]   ;;  %s34_s25 = int_to_ptr.vmem [resolvable:$true] %s33_s25 }
   0x5   :  { %36 = dma.hbm_to_vmem [thread:$0]  %s32_s23, 32, %s34_s25, [#allocation7]  }
   0x6   :  { %s22_s30 = sshll.u32 %s1369_s29, 4  ;;  %s41_s9 = sshll.u32 %s1713_s2, 4  ;;  %s23_s30 = int_to_ptr.vmem [resolvable:$true] %s22_s30  ;;  %s42_s9 = int_to_ptr.hbm [resolvable:$true] %s41_s9 }
   0x7   :  { %25 = dma.hbm_to_vmem [thread:$0]  %s21_s28, 128, %s23_s30, [#allocation4]  }
   0x8   :  { %s1370_s1 = smov [#allocation8]   ;;  %s56_s13 = sshll.u32 %s1715_s4, 4  ;;  %s57_s13 = int_to_ptr.hbm [resolvable:$true] %s56_s13 }
   0x9   :  { %s43_s10 = sshll.u32 %s1370_s1, 4  ;;  %s1371_s14 = smov 256   ;;  %s44_s10 = int_to_ptr.vmem [resolvable:$true] %s43_s10 }
   0xa   :  { %s1372_s0 = smov 16   ;;  %s1373_s15 = smov [#allocation9]  }
   0xb   :  { %49 = dma.hbm_to_vmem [thread:$0]  %s42_s9, 2048, %s44_s10, [#allocation7], %s1371_s14, %s1371_s14, %s1372_s0  }
   0xc   :  { %s58_s16 = sshll.u32 %s1373_s15, 4  ;;  %s1374_s17 = smov 128   ;;  %s59_s16 = int_to_ptr.vmem [resolvable:$true] %s58_s16 }
   0xd   :  { %s1375_s18 = smov 8  }
   0xe   :  { %64 = dma.hbm_to_vmem [thread:$0]  %s57_s13, 1024, %s59_s16, [#allocation10], %s1374_s17, %s1374_s17, %s1375_s18  }
   0xf   :  { %1360 = dma.done.wait [#allocation4], 128  }
  0x10   :  { %1361 = vsyncadd [#allocation4], 4294967168 }
  0x11   :  { %1362 = dma.done.wait [#allocation7], 2080  }
  0x12   :  { %1363 = vsyncadd [#allocation7], 4294965216 }
  0x13   :  { %1364 = dma.done.wait [#allocation10], 1024  }
  0x14   :  { %1365 = vsyncadd [#allocation10], 4294966272  ;;  %v103_v0 = vlaneseq  ;;  %v1426_v2 = vld [vmem:[#allocation8 + $0x70] sm:$0xff]  ;;  %v1428_v3 = vld [vmem:[#allocation8 + $0x78] sm:$0xff]  ;;  %v1376_v20 = vmov 0.0   ;;  %vm218_vm8 = vcmask 523264  }
  0x15   :  { %v1430_v4 = vld [vmem:[#allocation8 + $0x60] sm:$0xff]  ;;  %230 = vmatpush.msra.mxu0 %v1426_v2  ;;  %250 = vmatpush.msra.mxu1 %v1428_v3  ;;  %v1434_v5 = vld [vmem:[#allocation8 + $0x68] sm:$0xff]  ;;  %v1436_v6 = vld [vmem:[#allocation8 + $0x50] sm:$0xff]  ;;  %s1378_s21 = smov [#allocation11]   ;;  %s1095_s25 = sshll.u32 %s1717_s6, 4  ;;  %s1096_s25 = int_to_ptr.hbm [resolvable:$true] %s1095_s25 }
  0x16   :  { %v104_v1 = vshrl.u32 %v103_v0, 7  ;;  %v1438_v7 = vld [vmem:[#allocation8 + $0x58] sm:$0xff]  ;;  %335 = vmatpush.msra.mxu2 %v1426_v2  ;;  %355 = vmatpush.msra.mxu3 %v1428_v3  ;;  %v1444_v8 = vld [vmem:[#allocation8 + $0x40] sm:$0xff]  ;;  %v1446_v9 = vld [vmem:[#allocation8 + $0x48] sm:$0xff]  ;;  %s1093_s22 = sshll.u32 %s1378_s21, 4  ;;  %s1094_s22 = int_to_ptr.vmem [resolvable:$true] %s1093_s22 }
  0x17   :  { %231 = vmatpush.msra.mxu0 %v1430_v4  ;;  %251 = vmatpush.msra.mxu1 %v1434_v5  ;;  %v1452_v10 = vld [vmem:[#allocation3] sm:$0xff]  ;;  %v1463_v14 = vld [vmem:[#allocation8 + $0x20] sm:$0xff]  ;;  %v1465_v15 = vld [vmem:[#allocation8 + $0x28] sm:$0xff] }
  0x18   :  { %1157 = vset.pattern.permute.xlu0 %v104_v1  ;;  %1158 = vset.pattern.permute.xlu2 %v104_v1  ;;  %v1454_v11 = vld [vmem:[#allocation8 + $0x30] sm:$0xff]  ;;  %v1456_v12 = vld [vmem:[#allocation8 + $0x38] sm:$0xff]  ;;  %v102_v13 = vperm.slane %v1452_v10, 0  ;;  %v1478_v18 = vld [vmem:[#allocation8] sm:$0xff] }
  0x19   :  { %1159 = vset.pattern.permute.xlu1 %v104_v1  ;;  %336 = vmatpush.msra.mxu2 %v1430_v4  ;;  %v1470_v16 = vld [vmem:[#allocation8 + $0x10] sm:$0xff]  ;;  %v1472_v17 = vld [vmem:[#allocation8 + $0x18] sm:$0xff]  ;;  %v1480_v19 = vld [vmem:[#allocation8 + $0x8] sm:$0xff] }
  0x1a   :  { %356 = vmatpush.msra.mxu3 %v1434_v5  ;;  %232 = vmatpush.msra.mxu0 %v1436_v6  ;;  %v99_v21 = vld [vmem:[#allocation6] sm:$0x3]  ;;  %v100_v24 = vld [vmem:[%s1714_s3] sm:$0x3]  ;;  %s1377_s3 = smov 64  }
  0x1b   :  { %252 = vmatpush.msra.mxu1 %v1438_v7  ;;  %337 = vmatpush.msra.mxu2 %v1436_v6  ;;  %v1541_v22 = vperm.slane %v99_v21, 1  ;;  %v1547_v26 = vperm.slane %v100_v24, 1  ;;  %v1551_v45 = vperm.slane %v99_v21, 0  ;;  %v1554_v47 = vperm.slane %v100_v24, 0 }
  0x1c   :  { %357 = vmatpush.msra.mxu3 %v1438_v7  ;;  %233 = vmatpush.msra.mxu0 %v1444_v8  ;;  %v109_v24 = vperm.slane %v1452_v10, 1 }
  0x1d   :  { %253 = vmatpush.msra.mxu1 %v1446_v9  ;;  %338 = vmatpush.msra.mxu2 %v1444_v8 }
  0x1e   :  { %234 = vmatpush.msra.mxu0 %v1454_v11  ;;  %358 = vmatpush.msra.mxu3 %v1446_v9 }
  0x1f   :  { %254 = vmatpush.msra.mxu1 %v1456_v12  ;;  %339 = vmatpush.msra.mxu2 %v1454_v11 }
  0x20   :  { %107 = vperm.xlu0 %1157, %v102_v13   ;;  %235 = vmatpush.msra.mxu0 %v1463_v14 }
  0x21   :  { %255 = vmatpush.msra.mxu1 %v1465_v15  ;;  %359 = vmatpush.msra.mxu3 %v1456_v12 }
  0x22   :  { %340 = vmatpush.msra.mxu2 %v1463_v14  ;;  %236 = vmatpush.msra.mxu0 %v1470_v16 }
  0x23   :  { %256 = vmatpush.msra.mxu1 %v1472_v17  ;;  %360 = vmatpush.msra.mxu3 %v1465_v15 }
  0x24   :  { %341 = vmatpush.msra.mxu2 %v1470_v16  ;;  %237 = vmatpush.msra.mxu0 %v1478_v18 }
  0x25   :  { %257 = vmatpush.msra.mxu1 %v1480_v19  ;;  %238 = vmatmul.f32.vlgmr.msra.gmra.mxu0 %v1376_v20 }
  0x26   :  { %258 = vmatmul.f32.vlgmr.msra.gmra.mxu1 %v1376_v20  ;;  %361 = vmatpush.msra.mxu3 %v1472_v17 }
  0x27   :  { %342 = vmatpush.msra.mxu2 %v1478_v18  ;;  %440 = vmatpush.msrb.mxu0 %v1426_v2 }
  0x28   :  { %460 = vmatpush.msrb.mxu1 %v1428_v3  ;;  %362 = vmatpush.msra.mxu3 %v1480_v19 }
  0x29   :  { %545 = vmatpush.msrb.mxu2 %v1426_v2  ;;  %441 = vmatpush.msrb.mxu0 %v1430_v4 }
  0x2a   :  { %461 = vmatpush.msrb.mxu1 %v1434_v5  ;;  %565 = vmatpush.msrb.mxu3 %v1428_v3 }
  0x2b   :  { %546 = vmatpush.msrb.mxu2 %v1430_v4  ;;  %442 = vmatpush.msrb.mxu0 %v1436_v6 }
  0x2c   :  { %462 = vmatpush.msrb.mxu1 %v1438_v7  ;;  %566 = vmatpush.msrb.mxu3 %v1434_v5 }
  0x2d   :  { %547 = vmatpush.msrb.mxu2 %v1436_v6  ;;  %443 = vmatpush.msrb.mxu0 %v1444_v8 }
  0x2e   :  { %463 = vmatpush.msrb.mxu1 %v1446_v9  ;;  %567 = vmatpush.msrb.mxu3 %v1438_v7 }
  0x2f   :  { %548 = vmatpush.msrb.mxu2 %v1444_v8  ;;  %444 = vmatpush.msrb.mxu0 %v1454_v11 }
  0x30   :  { %464 = vmatpush.msrb.mxu1 %v1456_v12  ;;  %568 = vmatpush.msrb.mxu3 %v1446_v9 }
  0x31   :  { %549 = vmatpush.msrb.mxu2 %v1454_v11  ;;  %445 = vmatpush.msrb.mxu0 %v1463_v14 }
  0x32   :  { %465 = vmatpush.msrb.mxu1 %v1465_v15  ;;  %569 = vmatpush.msrb.mxu3 %v1456_v12 }
  0x33   :  { %550 = vmatpush.msrb.mxu2 %v1463_v14  ;;  %446 = vmatpush.msrb.mxu0 %v1470_v16 }
  0x34   :  { %466 = vmatpush.msrb.mxu1 %v1472_v17  ;;  %570 = vmatpush.msrb.mxu3 %v1465_v15 }
  0x35   :  { %551 = vmatpush.msrb.mxu2 %v1470_v16  ;;  %447 = vmatpush.msrb.mxu0 %v1478_v18 }
  0x36   :  { %467 = vmatpush.msrb.mxu1 %v1480_v19  ;;  %571 = vmatpush.msrb.mxu3 %v1472_v17 }
  0x37   :  { %552 = vmatpush.msrb.mxu2 %v1478_v18  ;;  %650 = vmatpush.msra.mxu0 %v1426_v2 }
  0x38   :  { %670 = vmatpush.msra.mxu1 %v1428_v3  ;;  %572 = vmatpush.msrb.mxu3 %v1480_v19 }
  0x39   :  { %651 = vmatpush.msra.mxu0 %v1430_v4  ;;  %114 = vperm.xlu2 %1158, %v109_v24  }
  0x3a   :  { %671 = vmatpush.msra.mxu1 %v1434_v5 }
  0x3b   :  { %652 = vmatpush.msra.mxu0 %v1436_v6 }
  0x3c   :  { %672 = vmatpush.msra.mxu1 %v1438_v7 }
  0x3d   :  { %653 = vmatpush.msra.mxu0 %v1444_v8 }
  0x3e   :  { %673 = vmatpush.msra.mxu1 %v1446_v9 }
  0x3f   :  { %654 = vmatpush.msra.mxu0 %v1454_v11 }
  0x40   :  { %674 = vmatpush.msra.mxu1 %v1456_v12 }
  0x41   :  { %655 = vmatpush.msra.mxu0 %v1463_v14 }
  0x42   :  { %675 = vmatpush.msra.mxu1 %v1465_v15 }
  0x43   :  { %656 = vmatpush.msra.mxu0 %v1470_v16 }
  0x44   :  { %676 = vmatpush.msra.mxu1 %v1472_v17 }
  0x45   :  { %657 = vmatpush.msra.mxu0 %v1478_v18 }
  0x46   :  { %677 = vmatpush.msra.mxu1 %v1480_v19 }
  0x92   :  { %v108_v23 = vpop.permute.xlu0 %107 }
  0x93   :  { %v164_v25 = vmul.f32 %v1541_v22, %v108_v23  ;;  %v163_v46 = vmul.f32 %v1551_v45, %v108_v23 }
  0x95   :  { %v185_v27 = vadd.f32 %v1547_v26, %v164_v25  ;;  %v184_v48 = vadd.f32 %v1554_v47, %v163_v46 }
  0xa2   :  { %v239_v49 = vpop.f32.mrf.mxu0 }
  0xa3   :  { %v259_v28 = vpop.f32.mrf.mxu1  ;;  %v262_v50 = vadd.f32 %v239_v49, %v184_v48 }
  0xa4   :  { %v263_v29 = vadd.f32 %v259_v28, %v185_v27  ;;  %v115_v28 = vpop.permute.xlu2 %114 }
  0xa5   :  { %v1107_v51 = vmul.f32 -1.442695, %v262_v50  ;;  %v116_v50 = vperm.slane %v1452_v10, 2 }
  0xa6   :  { %v1108_v30 = vmul.f32 -1.442695, %v263_v29  ;;  %v166_v29 = vmul.f32 %v1541_v22, %v115_v28 }
  0xa8   :  { %1161 = vpow2.f32 %v1108_v30  ;;  %v187_v30 = vadd.f32 %v1547_v26, %v166_v29 }
  0xae   :  { %v1162_v31 = vpop.eup %1161 }
  0xaf   :  { %v271_v32 = vadd.f32 1.0, %v1162_v31 }
  0xb1   :  { %1163 = vrcp.f32 %v271_v32  ;;  %v298_v36 = vand.u32 2147483648, %v271_v32  ;;  %v296_v38 = vand.u32 2147483647, %v271_v32  ;;  %vm292_vm1 = vweird.f32 %v271_v32 }
  0xb2   :  { %1165 = vpow2.f32 %v1107_v51  ;;  %v165_v51 = vmul.f32 %v1551_v45, %v115_v28 }
  0xb3   :  { %v299_v40 = vor.u32 1.1754944e-38, %v298_v36  ;;  %vm297_vm3 = vcmp.eq.f32.partialorder %v296_v38, 8.507059e+37 }
  0xb7   :  { %v1164_v33 = vpop.eup %1163 }
  0xb8   :  { %v288_v34 = vmul.f32 %v1164_v33, %v271_v32  ;;  %vm293_vm0 = vweird.f32 %v1164_v33  ;;  %v1166_v52 = vpop.eup %1165 }
  0xb9   :  { %vm294_vm2 = vmor %vm292_vm1, %vm293_vm0  ;;  %v270_v53 = vadd.f32 1.0, %v1166_v52  ;;  %v186_v52 = vadd.f32 %v1554_v47, %v165_v51 }
  0xba   :  { %v289_v35 = vsub.f32 1.0, %v288_v34 }
  0xbb   :  { %1167 = vrcp.f32 %v270_v53  ;;  %v283_v59 = vand.u32 2147483648, %v270_v53  ;;  %vm277_vm5 = vweird.f32 %v270_v53  ;;  %v281_v60 = vand.u32 2147483647, %v270_v53 }
  0xbc   :  { %v290_v37 = vmul.f32 %v1164_v33, %v289_v35 }
  0xbd   :  { %v284_v62 = vor.u32 1.1754944e-38, %v283_v59  ;;  %vm282_vm7 = vcmp.eq.f32.partialorder %v281_v60, 8.507059e+37 }
  0xbe   :  { %v291_v39 = vadd.f32 %v1164_v33, %v290_v37 }
  0xc0   :  { %v295_v41 = vsel %vm294_vm2, %v1164_v33, %v291_v39 }
  0xc1   :  { %v300_v42 = vsel %vm297_vm3, %v299_v40, %v295_v41  ;;  %v1168_v54 = vpop.eup %1167 }
  0xc2   :  { %v302_v43 = vmul.f32 2.0, %v300_v42  ;;  %v273_v55 = vmul.f32 %v1168_v54, %v270_v53  ;;  %vm278_vm4 = vweird.f32 %v1168_v54 }
  0xc3   :  { %vm279_vm6 = vmor %vm277_vm5, %vm278_vm4 }
  0xc4   :  { %v1109_v44 = vadd.f32 -1.0, %v302_v43  ;;  %v274_v56 = vsub.f32 1.0, %v273_v55 }
  0xc6   :  { %306 = vrot.lane.b32.xlu0 %v1109_v44, %s1377_s3  ;;  %v275_v57 = vmul.f32 %v1168_v54, %v274_v56 }
  0xc8   :  { %v276_v58 = vadd.f32 %v1168_v54, %v275_v57 }
  0xca   :  { %v280_v61 = vsel %vm279_vm6, %v1168_v54, %v276_v58 }
  0xcb   :  { %v285_v0 = vsel %vm282_vm7, %v284_v62, %v280_v61 }
  0xcc   :  { %v304_v13 = vmul.f32 0.0, %v285_v0 }
 0x138   :  { %v307_v63 = vpop.permute.xlu0 %306 }
 0x139   :  { %v309_v1 = vmul.f32 %v307_v63, %v285_v0 }
 0x13b   :  { %311 = vrot.lane.b32.xlu1 %v309_v1, %s1377_s3 }
 0x1ad   :  { %v312_v20 = vpop.permute.xlu1 %311 }
 0x1ae   :  { %v1558_v21 = vadd.f32 %v312_v20, %v304_v13 }
 0x1b0   :  { %1169 = vtanh.f32 %v1558_v21 }
 0x1b6   :  { %v1170_v23 = vpop.eup %1169 }
 0x1b7   :  { %317 = vrot.lane.b32.xlu1 %v1170_v23, %s1377_s3 }
 0x229   :  { %v318_v25 = vpop.permute.xlu1 %317 }
 0x22a   :  { %v320_v27 = vmul.f32 %v318_v25, %v300_v42 }
 0x22c   :  { %1110 = vmatmul.msk.f32.vlgmr.msra.gmra.mxu2 %vm218_vm8, %v320_v27  ;;  %1111 = vmatmul.msk.f32.vlgmr.msra.gmra.mxu3 %vm218_vm8, %v320_v27 }
 0x22d   :  { %755 = vmatpush.msra.mxu2 %v1426_v2  ;;  %775 = vmatpush.msra.mxu3 %v1428_v3 }
 0x22f   :  { %756 = vmatpush.msra.mxu2 %v1430_v4  ;;  %776 = vmatpush.msra.mxu3 %v1434_v5 }
 0x231   :  { %757 = vmatpush.msra.mxu2 %v1436_v6  ;;  %777 = vmatpush.msra.mxu3 %v1438_v7 }
 0x233   :  { %758 = vmatpush.msra.mxu2 %v1444_v8  ;;  %778 = vmatpush.msra.mxu3 %v1446_v9 }
 0x235   :  { %759 = vmatpush.msra.mxu2 %v1454_v11  ;;  %779 = vmatpush.msra.mxu3 %v1456_v12 }
 0x237   :  { %760 = vmatpush.msra.mxu2 %v1463_v14  ;;  %780 = vmatpush.msra.mxu3 %v1465_v15 }
 0x239   :  { %761 = vmatpush.msra.mxu2 %v1470_v16  ;;  %781 = vmatpush.msra.mxu3 %v1472_v17 }
 0x23b   :  { %762 = vmatpush.msra.mxu2 %v1478_v18  ;;  %782 = vmatpush.msra.mxu3 %v1480_v19 }
 0x2af   :  { %v364_v31 = vpop.f32.mrf.mxu3  ;;  %v344_v53 = vpop.f32.mrf.mxu2 }
 0x2b0   :  { %v368_v32 = vadd.f32 %v364_v31, %v187_v30  ;;  %v367_v54 = vadd.f32 %v344_v53, %v186_v52  ;;  %v123_v53 = vperm.slane %v1452_v10, 3 }
 0x2b2   :  { %v1113_v33 = vmul.f32 -1.442695, %v368_v32  ;;  %v1112_v55 = vmul.f32 -1.442695, %v367_v54 }
 0x2b4   :  { %1171 = vpow2.f32 %v1113_v33 }
 0x2ba   :  { %v1172_v34 = vpop.eup %1171 }
 0x2bb   :  { %v376_v35 = vadd.f32 1.0, %v1172_v34 }
 0x2bd   :  { %1173 = vrcp.f32 %v376_v35  ;;  %v403_v39 = vand.u32 2147483648, %v376_v35  ;;  %v401_v41 = vand.u32 2147483647, %v376_v35  ;;  %vm397_vm10 = vweird.f32 %v376_v35 }
 0x2be   :  { %1175 = vpow2.f32 %v1112_v55 }
 0x2bf   :  { %v404_v43 = vor.u32 1.1754944e-38, %v403_v39  ;;  %vm402_vm12 = vcmp.eq.f32.partialorder %v401_v41, 8.507059e+37 }
 0x2c3   :  { %v1174_v36 = vpop.eup %1173 }
 0x2c4   :  { %v393_v37 = vmul.f32 %v1174_v36, %v376_v35  ;;  %vm398_vm9 = vweird.f32 %v1174_v36  ;;  %v1176_v56 = vpop.eup %1175 }
 0x2c5   :  { %vm399_vm11 = vmor %vm397_vm10, %vm398_vm9  ;;  %v375_v57 = vadd.f32 1.0, %v1176_v56 }
 0x2c6   :  { %v394_v38 = vsub.f32 1.0, %v393_v37 }
 0x2c7   :  { %1177 = vrcp.f32 %v375_v57  ;;  %v388_v63 = vand.u32 2147483648, %v375_v57  ;;  %vm382_vm14 = vweird.f32 %v375_v57  ;;  %v386_v0 = vand.u32 2147483647, %v375_v57 }
 0x2c8   :  { %v395_v40 = vmul.f32 %v1174_v36, %v394_v38 }
 0x2c9   :  { %v389_v13 = vor.u32 1.1754944e-38, %v388_v63  ;;  %vm387_vm0 = vcmp.eq.f32.partialorder %v386_v0, 8.507059e+37 }
 0x2ca   :  { %v396_v42 = vadd.f32 %v1174_v36, %v395_v40 }
 0x2cc   :  { %v400_v44 = vsel %vm399_vm11, %v1174_v36, %v396_v42 }
 0x2cd   :  { %v405_v46 = vsel %vm402_vm12, %v404_v43, %v400_v44  ;;  %v1178_v58 = vpop.eup %1177 }
 0x2ce   :  { %v407_v48 = vmul.f32 2.0, %v405_v46  ;;  %v378_v59 = vmul.f32 %v1178_v58, %v375_v57  ;;  %vm383_vm13 = vweird.f32 %v1178_v58 }
 0x2cf   :  { %vm384_vm15 = vmor %vm382_vm14, %vm383_vm13 }
 0x2d0   :  { %v1114_v49 = vadd.f32 -1.0, %v407_v48  ;;  %v379_v60 = vsub.f32 1.0, %v378_v59 }
 0x2d2   :  { %411 = vrot.lane.b32.xlu2 %v1114_v49, %s1377_s3  ;;  %v380_v61 = vmul.f32 %v1178_v58, %v379_v60 }
 0x2d4   :  { %v381_v62 = vadd.f32 %v1178_v58, %v380_v61 }
 0x2d6   :  { %v385_v1 = vsel %vm384_vm15, %v1178_v58, %v381_v62 }
 0x2d7   :  { %v390_v23 = vsel %vm387_vm0, %v389_v13, %v385_v1 }
 0x2d8   :  { %v409_v25 = vmul.f32 %v390_v23, %v1558_v21 }
 0x2da   :  { %121 = vperm.xlu2 %1158, %v116_v50  }
 0x32c   :  { %v412_v20 = vpop.permute.xlu2 %411 }
 0x32d   :  { %v414_v24 = vmul.f32 %v412_v20, %v390_v23 }
 0x32f   :  { %416 = vrot.lane.b32.xlu0 %v414_v24, %s1377_s3 }
 0x334   :  { %v122_v21 = vpop.permute.xlu2 %121 }
 0x335   :  { %v168_v32 = vmul.f32 %v1541_v22, %v122_v21  ;;  %v167_v54 = vmul.f32 %v1551_v45, %v122_v21 }
 0x337   :  { %v189_v33 = vadd.f32 %v1547_v26, %v168_v32  ;;  %v188_v56 = vadd.f32 %v1554_v47, %v167_v54 }
 0x3a1   :  { %v417_v27 = vpop.permute.xlu0 %416 }
 0x3a2   :  { %v1589_v28 = vadd.f32 %v417_v27, %v409_v25 }
 0x3a4   :  { %1179 = vtanh.f32 %v1589_v28 }
 0x3aa   :  { %v1180_v29 = vpop.eup %1179 }
 0x3ab   :  { %422 = vrot.lane.b32.xlu1 %v1180_v29, %s1377_s3 }
 0x41d   :  { %v423_v30 = vpop.permute.xlu1 %422 }
 0x41e   :  { %v425_v31 = vmul.f32 %v423_v30, %v405_v46 }
 0x420   :  { %1115 = vmatmul.msk.f32.vlgmr.msrb.gmra.mxu0 %vm218_vm8, %v425_v31  ;;  %1116 = vmatmul.msk.f32.vlgmr.msrb.gmra.mxu1 %vm218_vm8, %v425_v31 }
 0x421   :  { %860 = vmatpush.msrb.mxu0 %v1426_v2  ;;  %880 = vmatpush.msrb.mxu1 %v1428_v3 }
 0x423   :  { %861 = vmatpush.msrb.mxu0 %v1430_v4  ;;  %881 = vmatpush.msrb.mxu1 %v1434_v5 }
 0x425   :  { %862 = vmatpush.msrb.mxu0 %v1436_v6  ;;  %882 = vmatpush.msrb.mxu1 %v1438_v7 }
 0x427   :  { %863 = vmatpush.msrb.mxu0 %v1444_v8  ;;  %883 = vmatpush.msrb.mxu1 %v1446_v9 }
 0x429   :  { %864 = vmatpush.msrb.mxu0 %v1454_v11  ;;  %884 = vmatpush.msrb.mxu1 %v1456_v12 }
 0x42b   :  { %865 = vmatpush.msrb.mxu0 %v1463_v14  ;;  %885 = vmatpush.msrb.mxu1 %v1465_v15 }
 0x42d   :  { %866 = vmatpush.msrb.mxu0 %v1470_v16  ;;  %886 = vmatpush.msrb.mxu1 %v1472_v17 }
 0x42f   :  { %867 = vmatpush.msrb.mxu0 %v1478_v18  ;;  %887 = vmatpush.msrb.mxu1 %v1480_v19 }
 0x49d   :  { %v469_v34 = vpop.f32.mrf.mxu1  ;;  %v449_v55 = vpop.f32.mrf.mxu0 }
 0x49e   :  { %v473_v35 = vadd.f32 %v469_v34, %v189_v33  ;;  %v472_v57 = vadd.f32 %v449_v55, %v188_v56 }
 0x4a0   :  { %v1118_v36 = vmul.f32 -1.442695, %v473_v35  ;;  %v1117_v58 = vmul.f32 -1.442695, %v472_v57 }
 0x4a2   :  { %1181 = vpow2.f32 %v1118_v36 }
 0x4a8   :  { %v1182_v37 = vpop.eup %1181 }
 0x4a9   :  { %v481_v38 = vadd.f32 1.0, %v1182_v37 }
 0x4ab   :  { %1183 = vrcp.f32 %v481_v38  ;;  %v508_v42 = vand.u32 2147483648, %v481_v38  ;;  %v506_v44 = vand.u32 2147483647, %v481_v38  ;;  %vm502_vm2 = vweird.f32 %v481_v38 }
 0x4ac   :  { %1185 = vpow2.f32 %v1117_v58 }
 0x4ad   :  { %v509_v48 = vor.u32 1.1754944e-38, %v508_v42  ;;  %vm507_vm4 = vcmp.eq.f32.partialorder %v506_v44, 8.507059e+37 }
 0x4b1   :  { %v1184_v39 = vpop.eup %1183 }
 0x4b2   :  { %v498_v40 = vmul.f32 %v1184_v39, %v481_v38  ;;  %vm503_vm1 = vweird.f32 %v1184_v39  ;;  %v1186_v59 = vpop.eup %1185 }
 0x4b3   :  { %vm504_vm3 = vmor %vm502_vm2, %vm503_vm1  ;;  %v480_v60 = vadd.f32 1.0, %v1186_v59 }
 0x4b4   :  { %v499_v41 = vsub.f32 1.0, %v498_v40 }
 0x4b5   :  { %1187 = vrcp.f32 %v480_v60  ;;  %v493_v13 = vand.u32 2147483648, %v480_v60  ;;  %vm487_vm6 = vweird.f32 %v480_v60  ;;  %v491_v20 = vand.u32 2147483647, %v480_v60 }
 0x4b6   :  { %v500_v43 = vmul.f32 %v1184_v39, %v499_v41 }
 0x4b7   :  { %v494_v24 = vor.u32 1.1754944e-38, %v493_v13  ;;  %vm492_vm9 = vcmp.eq.f32.partialorder %v491_v20, 8.507059e+37 }
 0x4b8   :  { %v501_v46 = vadd.f32 %v1184_v39, %v500_v43 }
 0x4ba   :  { %v505_v49 = vsel %vm504_vm3, %v1184_v39, %v501_v46 }
 0x4bb   :  { %v510_v50 = vsel %vm507_vm4, %v509_v48, %v505_v49  ;;  %v1188_v61 = vpop.eup %1187 }
 0x4bc   :  { %v512_v51 = vmul.f32 2.0, %v510_v50  ;;  %v483_v62 = vmul.f32 %v1188_v61, %v480_v60  ;;  %vm488_vm5 = vweird.f32 %v1188_v61 }
 0x4bd   :  { %vm489_vm7 = vmor %vm487_vm6, %vm488_vm5 }
 0x4be   :  { %v1119_v52 = vadd.f32 -1.0, %v512_v51  ;;  %v484_v63 = vsub.f32 1.0, %v483_v62 }
 0x4c0   :  { %516 = vrot.lane.b32.xlu0 %v1119_v52, %s1377_s3  ;;  %v485_v0 = vmul.f32 %v1188_v61, %v484_v63  ;;  %v130_v63 = vperm.slane %v1452_v10, 4 }
 0x4c2   :  { %v486_v1 = vadd.f32 %v1188_v61, %v485_v0 }
 0x4c4   :  { %v490_v23 = vsel %vm489_vm7, %v1188_v61, %v486_v1 }
 0x4c5   :  { %v495_v27 = vsel %vm492_vm9, %v494_v24, %v490_v23 }
 0x4c6   :  { %v514_v30 = vmul.f32 %v495_v27, %v1589_v28 }
 0x4c8   :  { %128 = vperm.xlu0 %1157, %v123_v53  }
 0x532   :  { %v517_v25 = vpop.permute.xlu0 %516 }
 0x533   :  { %v519_v29 = vmul.f32 %v517_v25, %v495_v27 }
 0x535   :  { %521 = vrot.lane.b32.xlu1 %v519_v29, %s1377_s3 }
 0x5a7   :  { %v522_v31 = vpop.permute.xlu1 %521 }
 0x5a8   :  { %v1619_v21 = vadd.f32 %v522_v31, %v514_v30 }
 0x5aa   :  { %1189 = vtanh.f32 %v1619_v21 }
 0x5b0   :  { %v1190_v32 = vpop.eup %1189 }
 0x5b1   :  { %527 = vrot.lane.b32.xlu2 %v1190_v32, %s1377_s3 }
 0x60b   :  { %v528_v33 = vpop.permute.xlu2 %527 }
 0x60c   :  { %v530_v34 = vmul.f32 %v528_v33, %v510_v50 }
 0x60e   :  { %1120 = vmatmul.msk.f32.vlgmr.msrb.gmra.mxu2 %vm218_vm8, %v530_v34  ;;  %1121 = vmatmul.msk.f32.vlgmr.msrb.gmra.mxu3 %vm218_vm8, %v530_v34 }
 0x60f   :  { %965 = vmatpush.msrb.mxu2 %v1426_v2  ;;  %985 = vmatpush.msrb.mxu3 %v1428_v3  ;;  %v129_v2 = vpop.permute.xlu0 %128 }
 0x610   :  { %v170_v3 = vmul.f32 %v1541_v22, %v129_v2  ;;  %v169_v38 = vmul.f32 %v1551_v45, %v129_v2 }
 0x611   :  { %966 = vmatpush.msrb.mxu2 %v1430_v4  ;;  %986 = vmatpush.msrb.mxu3 %v1434_v5 }
 0x612   :  { %v191_v4 = vadd.f32 %v1547_v26, %v170_v3  ;;  %v190_v40 = vadd.f32 %v1554_v47, %v169_v38 }
 0x613   :  { %967 = vmatpush.msrb.mxu2 %v1436_v6  ;;  %987 = vmatpush.msrb.mxu3 %v1438_v7 }
 0x615   :  { %968 = vmatpush.msrb.mxu2 %v1444_v8  ;;  %988 = vmatpush.msrb.mxu3 %v1446_v9 }
 0x617   :  { %969 = vmatpush.msrb.mxu2 %v1454_v11  ;;  %989 = vmatpush.msrb.mxu3 %v1456_v12 }
 0x619   :  { %970 = vmatpush.msrb.mxu2 %v1463_v14  ;;  %990 = vmatpush.msrb.mxu3 %v1465_v15 }
 0x61b   :  { %971 = vmatpush.msrb.mxu2 %v1470_v16  ;;  %991 = vmatpush.msrb.mxu3 %v1472_v17 }
 0x61d   :  { %972 = vmatpush.msrb.mxu2 %v1478_v18  ;;  %992 = vmatpush.msrb.mxu3 %v1480_v19 }
 0x691   :  { %v574_v5 = vpop.f32.mrf.mxu3  ;;  %v554_v39 = vpop.f32.mrf.mxu2 }
 0x692   :  { %v578_v6 = vadd.f32 %v574_v5, %v191_v4  ;;  %v577_v41 = vadd.f32 %v554_v39, %v190_v40 }
 0x694   :  { %v1123_v7 = vmul.f32 -1.442695, %v578_v6  ;;  %v1122_v42 = vmul.f32 -1.442695, %v577_v41 }
 0x696   :  { %1191 = vpow2.f32 %v1123_v7 }
 0x69c   :  { %v1192_v8 = vpop.eup %1191 }
 0x69d   :  { %v586_v9 = vadd.f32 1.0, %v1192_v8 }
 0x69f   :  { %1193 = vrcp.f32 %v586_v9  ;;  %v613_v15 = vand.u32 2147483648, %v586_v9  ;;  %v611_v17 = vand.u32 2147483647, %v586_v9  ;;  %vm607_vm11 = vweird.f32 %v586_v9 }
 0x6a0   :  { %1195 = vpow2.f32 %v1122_v42 }
 0x6a1   :  { %v614_v19 = vor.u32 1.1754944e-38, %v613_v15  ;;  %vm612_vm13 = vcmp.eq.f32.partialorder %v611_v17, 8.507059e+37 }
 0x6a5   :  { %v1194_v11 = vpop.eup %1193 }
 0x6a6   :  { %v603_v12 = vmul.f32 %v1194_v11, %v586_v9  ;;  %vm608_vm10 = vweird.f32 %v1194_v11  ;;  %v1196_v43 = vpop.eup %1195  ;;  %v137_v9 = vperm.slane %v1452_v10, 5 }
 0x6a7   :  { %vm609_vm12 = vmor %vm607_vm11, %vm608_vm10  ;;  %v585_v44 = vadd.f32 1.0, %v1196_v43 }
 0x6a8   :  { %v604_v14 = vsub.f32 1.0, %v603_v12 }
 0x6a9   :  { %1197 = vrcp.f32 %v585_v44  ;;  %v598_v52 = vand.u32 2147483648, %v585_v44  ;;  %vm592_vm15 = vweird.f32 %v585_v44  ;;  %v596_v53 = vand.u32 2147483647, %v585_v44 }
 0x6aa   :  { %v605_v16 = vmul.f32 %v1194_v11, %v604_v14 }
 0x6ab   :  { %v599_v55 = vor.u32 1.1754944e-38, %v598_v52  ;;  %vm597_vm1 = vcmp.eq.f32.partialorder %v596_v53, 8.507059e+37 }
 0x6ac   :  { %v606_v18 = vadd.f32 %v1194_v11, %v605_v16 }
 0x6ae   :  { %v610_v28 = vsel %vm609_vm12, %v1194_v11, %v606_v18 }
 0x6af   :  { %v615_v35 = vsel %vm612_vm13, %v614_v19, %v610_v28  ;;  %v1198_v46 = vpop.eup %1197 }
 0x6b0   :  { %v617_v36 = vmul.f32 2.0, %v615_v35  ;;  %v588_v48 = vmul.f32 %v1198_v46, %v585_v44  ;;  %vm593_vm14 = vweird.f32 %v1198_v46 }
 0x6b1   :  { %vm594_vm0 = vmor %vm592_vm15, %vm593_vm14 }
 0x6b2   :  { %v1124_v37 = vadd.f32 -1.0, %v617_v36  ;;  %v589_v49 = vsub.f32 1.0, %v588_v48 }
 0x6b4   :  { %621 = vrot.lane.b32.xlu1 %v1124_v37, %s1377_s3  ;;  %v590_v50 = vmul.f32 %v1198_v46, %v589_v49 }
 0x6b6   :  { %v591_v51 = vadd.f32 %v1198_v46, %v590_v50 }
 0x6b8   :  { %v595_v54 = vsel %vm594_vm0, %v1198_v46, %v591_v51 }
 0x6b9   :  { %v600_v57 = vsel %vm597_vm1, %v599_v55, %v595_v54 }
 0x6ba   :  { %v619_v59 = vmul.f32 %v600_v57, %v1619_v21 }
 0x6bc   :  { %135 = vperm.xlu1 %1159, %v130_v63  }
 0x726   :  { %v622_v56 = vpop.permute.xlu1 %621 }
 0x727   :  { %v624_v58 = vmul.f32 %v622_v56, %v600_v57 }
 0x729   :  { %626 = vrot.lane.b32.xlu2 %v624_v58, %s1377_s3 }
 0x72e   :  { %v136_v13 = vpop.permute.xlu1 %135 }
 0x72f   :  { %v172_v20 = vmul.f32 %v1541_v22, %v136_v13  ;;  %v171_v11 = vmul.f32 %v1551_v45, %v136_v13 }
 0x731   :  { %v193_v23 = vadd.f32 %v1547_v26, %v172_v20  ;;  %v192_v12 = vadd.f32 %v1554_v47, %v171_v11 }
 0x783   :  { %v627_v60 = vpop.permute.xlu2 %626 }
 0x784   :  { %v1648_v61 = vadd.f32 %v627_v60, %v619_v59 }
 0x786   :  { %1199 = vtanh.f32 %v1648_v61 }
 0x78c   :  { %v1200_v62 = vpop.eup %1199 }
 0x78d   :  { %632 = vrot.lane.b32.xlu0 %v1200_v62, %s1377_s3 }
 0x7ff   :  { %v633_v0 = vpop.permute.xlu0 %632 }
 0x800   :  { %v635_v1 = vmul.f32 %v633_v0, %v615_v35 }
 0x802   :  { %1125 = vmatmul.msk.f32.vlgmr.msra.gmra.mxu0 %vm218_vm8, %v635_v1  ;;  %1126 = vmatmul.msk.f32.vlgmr.msra.gmra.mxu1 %vm218_vm8, %v635_v1 }
 0x87f   :  { %v679_v24 = vpop.f32.mrf.mxu1  ;;  %v659_v14 = vpop.f32.mrf.mxu0 }
 0x880   :  { %v683_v25 = vadd.f32 %v679_v24, %v193_v23  ;;  %v682_v15 = vadd.f32 %v659_v14, %v192_v12 }
 0x882   :  { %v1128_v27 = vmul.f32 -1.442695, %v683_v25  ;;  %v1127_v16 = vmul.f32 -1.442695, %v682_v15 }
 0x884   :  { %1201 = vpow2.f32 %v1128_v27 }
 0x88a   :  { %v1202_v29 = vpop.eup %1201 }
 0x88b   :  { %v691_v30 = vadd.f32 1.0, %v1202_v29 }
 0x88d   :  { %1203 = vrcp.f32 %v691_v30  ;;  %v718_v33 = vand.u32 2147483648, %v691_v30  ;;  %v716_v2 = vand.u32 2147483647, %v691_v30  ;;  %vm712_vm3 = vweird.f32 %v691_v30 }
 0x88e   :  { %1205 = vpow2.f32 %v1127_v16 }
 0x88f   :  { %v719_v4 = vor.u32 1.1754944e-38, %v718_v33  ;;  %vm717_vm5 = vcmp.eq.f32.partialorder %v716_v2, 8.507059e+37 }
 0x893   :  { %v1204_v31 = vpop.eup %1203 }
 0x894   :  { %v708_v21 = vmul.f32 %v1204_v31, %v691_v30  ;;  %vm713_vm2 = vweird.f32 %v1204_v31  ;;  %v1206_v17 = vpop.eup %1205  ;;  %v144_v30 = vperm.slane %v1452_v10, 6 }
 0x895   :  { %vm714_vm4 = vmor %vm712_vm3, %vm713_vm2  ;;  %v690_v18 = vadd.f32 1.0, %v1206_v17 }
 0x896   :  { %v709_v32 = vsub.f32 1.0, %v708_v21 }
 0x897   :  { %1207 = vrcp.f32 %v690_v18  ;;  %v703_v38 = vand.u32 2147483648, %v690_v18  ;;  %vm697_vm7 = vweird.f32 %v690_v18  ;;  %v701_v39 = vand.u32 2147483647, %v690_v18 }
 0x898   :  { %v710_v34 = vmul.f32 %v1204_v31, %v709_v32 }
 0x899   :  { %v704_v41 = vor.u32 1.1754944e-38, %v703_v38  ;;  %vm702_vm10 = vcmp.eq.f32.partialorder %v701_v39, 8.507059e+37 }
 0x89a   :  { %v711_v3 = vadd.f32 %v1204_v31, %v710_v34 }
 0x89c   :  { %v715_v5 = vsel %vm714_vm4, %v1204_v31, %v711_v3 }
 0x89d   :  { %v720_v6 = vsel %vm717_vm5, %v719_v4, %v715_v5  ;;  %v1208_v19 = vpop.eup %1207 }
 0x89e   :  { %v722_v7 = vmul.f32 2.0, %v720_v6  ;;  %v693_v28 = vmul.f32 %v1208_v19, %v690_v18  ;;  %vm698_vm6 = vweird.f32 %v1208_v19 }
 0x89f   :  { %vm699_vm9 = vmor %vm697_vm7, %vm698_vm6 }
 0x8a0   :  { %v1129_v8 = vadd.f32 -1.0, %v722_v7  ;;  %v694_v35 = vsub.f32 1.0, %v693_v28 }
 0x8a2   :  { %726 = vrot.lane.b32.xlu2 %v1129_v8, %s1377_s3  ;;  %v695_v36 = vmul.f32 %v1208_v19, %v694_v35 }
 0x8a4   :  { %v696_v37 = vadd.f32 %v1208_v19, %v695_v36 }
 0x8a6   :  { %v700_v40 = vsel %vm699_vm9, %v1208_v19, %v696_v37 }
 0x8a7   :  { %v705_v43 = vsel %vm702_vm10, %v704_v41, %v700_v40 }
 0x8a8   :  { %v724_v46 = vmul.f32 %v705_v43, %v1648_v61 }
 0x8aa   :  { %142 = vperm.xlu2 %1158, %v137_v9  }
 0x8fc   :  { %v727_v42 = vpop.permute.xlu2 %726 }
 0x8fd   :  { %v729_v44 = vmul.f32 %v727_v42, %v705_v43 }
 0x8ff   :  { %731 = vrot.lane.b32.xlu0 %v729_v44, %s1377_s3 }
 0x904   :  { %v143_v53 = vpop.permute.xlu2 %142 }
 0x905   :  { %v174_v54 = vmul.f32 %v1541_v22, %v143_v53  ;;  %v173_v31 = vmul.f32 %v1551_v45, %v143_v53 }
 0x907   :  { %v195_v55 = vadd.f32 %v1547_v26, %v174_v54  ;;  %v194_v32 = vadd.f32 %v1554_v47, %v173_v31 }
 0x971   :  { %v732_v48 = vpop.permute.xlu0 %731 }
 0x972   :  { %v1663_v49 = vadd.f32 %v732_v48, %v724_v46 }
 0x974   :  { %1209 = vtanh.f32 %v1663_v49 }
 0x97a   :  { %v1210_v50 = vpop.eup %1209 }
 0x97b   :  { %737 = vrot.lane.b32.xlu1 %v1210_v50, %s1377_s3 }
 0x9ed   :  { %v738_v51 = vpop.permute.xlu1 %737 }
 0x9ee   :  { %v740_v52 = vmul.f32 %v738_v51, %v720_v6 }
 0x9f0   :  { %1130 = vmatmul.msk.f32.vlgmr.msra.gmra.mxu2 %vm218_vm8, %v740_v52  ;;  %1131 = vmatmul.msk.f32.vlgmr.msra.gmra.mxu3 %vm218_vm8, %v740_v52 }
 0xa73   :  { %v784_v56 = vpop.f32.mrf.mxu3  ;;  %v764_v21 = vpop.f32.mrf.mxu2 }
 0xa74   :  { %v788_v57 = vadd.f32 %v784_v56, %v195_v55  ;;  %v787_v33 = vadd.f32 %v764_v21, %v194_v32 }
 0xa76   :  { %v1133_v58 = vmul.f32 -1.442695, %v788_v57  ;;  %v1132_v34 = vmul.f32 -1.442695, %v787_v33 }
 0xa78   :  { %1211 = vpow2.f32 %v1133_v58 }
 0xa7e   :  { %v1212_v59 = vpop.eup %1211 }
 0xa7f   :  { %v796_v60 = vadd.f32 1.0, %v1212_v59  ;;  %v1239_v59 = vld [vmem:[#allocation3] sm:$0xff] }
 0xa81   :  { %1213 = vrcp.f32 %v796_v60  ;;  %v823_v0 = vand.u32 2147483648, %v796_v60  ;;  %v821_v13 = vand.u32 2147483647, %v796_v60  ;;  %vm817_vm12 = vweird.f32 %v796_v60 }
 0xa82   :  { %1215 = vpow2.f32 %v1132_v34 }
 0xa83   :  { %v824_v23 = vor.u32 1.1754944e-38, %v823_v0  ;;  %vm822_vm14 = vcmp.eq.f32.partialorder %v821_v13, 8.507059e+37 }
 0xa87   :  { %v1214_v61 = vpop.eup %1213 }
 0xa88   :  { %v813_v62 = vmul.f32 %v1214_v61, %v796_v60  ;;  %vm818_vm11 = vweird.f32 %v1214_v61  ;;  %v1216_v2 = vpop.eup %1215  ;;  %v151_v60 = vperm.slane %v1239_v59, 7 }
 0xa89   :  { %vm819_vm13 = vmor %vm817_vm12, %vm818_vm11  ;;  %v795_v3 = vadd.f32 1.0, %v1216_v2 }
 0xa8a   :  { %v814_v63 = vsub.f32 1.0, %v813_v62 }
 0xa8b   :  { %1217 = vrcp.f32 %v795_v3  ;;  %v808_v9 = vand.u32 2147483648, %v795_v3  ;;  %vm802_vm0 = vweird.f32 %v795_v3  ;;  %v806_v10 = vand.u32 2147483647, %v795_v3 }
 0xa8c   :  { %v815_v1 = vmul.f32 %v1214_v61, %v814_v63 }
 0xa8d   :  { %v809_v12 = vor.u32 1.1754944e-38, %v808_v9  ;;  %vm807_vm2 = vcmp.eq.f32.partialorder %v806_v10, 8.507059e+37 }
 0xa8e   :  { %v816_v20 = vadd.f32 %v1214_v61, %v815_v1 }
 0xa90   :  { %v820_v24 = vsel %vm819_vm13, %v1214_v61, %v816_v20 }
 0xa91   :  { %v825_v25 = vsel %vm822_vm14, %v824_v23, %v820_v24  ;;  %v1218_v4 = vpop.eup %1217 }
 0xa92   :  { %v827_v27 = vmul.f32 2.0, %v825_v25  ;;  %v798_v5 = vmul.f32 %v1218_v4, %v795_v3  ;;  %vm803_vm15 = vweird.f32 %v1218_v4 }
 0xa93   :  { %vm804_vm1 = vmor %vm802_vm0, %vm803_vm15 }
 0xa94   :  { %v1134_v29 = vadd.f32 -1.0, %v827_v27  ;;  %v799_v6 = vsub.f32 1.0, %v798_v5 }
 0xa96   :  { %831 = vrot.lane.b32.xlu0 %v1134_v29, %s1377_s3  ;;  %v800_v7 = vmul.f32 %v1218_v4, %v799_v6 }
 0xa98   :  { %v801_v8 = vadd.f32 %v1218_v4, %v800_v7 }
 0xa9a   :  { %v805_v11 = vsel %vm804_vm1, %v1218_v4, %v801_v8 }
 0xa9b   :  { %v810_v15 = vsel %vm807_vm2, %v809_v12, %v805_v11 }
 0xa9c   :  { %v829_v17 = vmul.f32 %v810_v15, %v1663_v49 }
 0xa9e   :  { %149 = vperm.xlu0 %1157, %v144_v30  }
 0xb08   :  { %v832_v14 = vpop.permute.xlu0 %831 }
 0xb09   :  { %v834_v16 = vmul.f32 %v832_v14, %v810_v15 }
 0xb0b   :  { %836 = vrot.lane.b32.xlu1 %v834_v16, %s1377_s3 }
 0xb10   :  { %v150_v37 = vpop.permute.xlu0 %149 }
 0xb11   :  { %v176_v38 = vmul.f32 %v1541_v22, %v150_v37  ;;  %v175_v61 = vmul.f32 %v1551_v45, %v150_v37 }
 0xb13   :  { %v197_v39 = vadd.f32 %v1547_v26, %v176_v38  ;;  %v196_v63 = vadd.f32 %v1554_v47, %v175_v61  ;;  %v1057_v61 = vld [vmem:[#allocation9 + $0x38] sm:$0xff] }
 0xb14   :  { %1075 = vmatpush.msra.mxu0 %v1057_v61 }
 0xb7d   :  { %v837_v18 = vpop.permute.xlu1 %836 }
 0xb7e   :  { %v1677_v19 = vadd.f32 %v837_v18, %v829_v17 }
 0xb80   :  { %1219 = vtanh.f32 %v1677_v19 }
 0xb86   :  { %v1220_v28 = vpop.eup %1219 }
 0xb87   :  { %842 = vrot.lane.b32.xlu2 %v1220_v28, %s1377_s3 }
 0xbe1   :  { %v843_v35 = vpop.permute.xlu2 %842 }
 0xbe2   :  { %v845_v36 = vmul.f32 %v843_v35, %v825_v25 }
 0xbe4   :  { %1135 = vmatmul.msk.f32.vlgmr.msrb.gmra.mxu0 %vm218_vm8, %v845_v36  ;;  %1136 = vmatmul.msk.f32.vlgmr.msrb.gmra.mxu1 %vm218_vm8, %v845_v36 }
 0xc61   :  { %v889_v40 = vpop.f32.mrf.mxu1  ;;  %v869_v62 = vpop.f32.mrf.mxu0 }
 0xc62   :  { %v893_v41 = vadd.f32 %v889_v40, %v197_v39  ;;  %v892_v0 = vadd.f32 %v869_v62, %v196_v63  ;;  %v1056_v62 = vld [vmem:[#allocation9 + $0x30] sm:$0xff]  ;;  %v1055_v63 = vld [vmem:[#allocation9 + $0x28] sm:$0xff] }
 0xc63   :  { %1076 = vmatpush.msra.mxu0 %v1056_v62 }
 0xc64   :  { %v1138_v42 = vmul.f32 -1.442695, %v893_v41  ;;  %v1137_v1 = vmul.f32 -1.442695, %v892_v0  ;;  %v1054_v0 = vld [vmem:[#allocation9 + $0x20] sm:$0xff] }
 0xc65   :  { %1077 = vmatpush.msra.mxu0 %v1055_v63 }
 0xc66   :  { %1221 = vpow2.f32 %v1138_v42 }
 0xc67   :  { %1078 = vmatpush.msra.mxu0 %v1054_v0 }
 0xc6c   :  { %v1222_v43 = vpop.eup %1221 }
 0xc6d   :  { %v901_v44 = vadd.f32 1.0, %v1222_v43 }
 0xc6f   :  { %1223 = vrcp.f32 %v901_v44  ;;  %v928_v50 = vand.u32 2147483648, %v901_v44  ;;  %v926_v52 = vand.u32 2147483647, %v901_v44  ;;  %vm922_vm4 = vweird.f32 %v901_v44 }
 0xc70   :  { %1225 = vpow2.f32 %v1137_v1  ;;  %v1053_v1 = vld [vmem:[#allocation9 + $0x18] sm:$0xff] }
 0xc71   :  { %v929_v54 = vor.u32 1.1754944e-38, %v928_v50  ;;  %vm927_vm6 = vcmp.eq.f32.partialorder %v926_v52, 8.507059e+37  ;;  %1079 = vmatpush.msra.mxu0 %v1053_v1 }
 0xc75   :  { %v1224_v46 = vpop.eup %1223 }
 0xc76   :  { %v918_v48 = vmul.f32 %v1224_v46, %v901_v44  ;;  %vm923_vm3 = vweird.f32 %v1224_v46  ;;  %v1226_v13 = vpop.eup %1225 }
 0xc77   :  { %vm924_vm5 = vmor %vm922_vm4, %vm923_vm3  ;;  %v900_v20 = vadd.f32 1.0, %v1226_v13  ;;  %v1052_v13 = vld [vmem:[#allocation9 + $0x10] sm:$0xff] }
 0xc78   :  { %v919_v49 = vsub.f32 1.0, %v918_v48  ;;  %1080 = vmatpush.msra.mxu0 %v1052_v13 }
 0xc79   :  { %1227 = vrcp.f32 %v900_v20  ;;  %v913_v30 = vand.u32 2147483648, %v900_v20  ;;  %vm907_vm9 = vweird.f32 %v900_v20  ;;  %v911_v31 = vand.u32 2147483647, %v900_v20 }
 0xc7a   :  { %v920_v51 = vmul.f32 %v1224_v46, %v919_v49 }
 0xc7b   :  { %v914_v32 = vor.u32 1.1754944e-38, %v913_v30  ;;  %vm912_vm11 = vcmp.eq.f32.partialorder %v911_v31, 8.507059e+37  ;;  %v1160_v30 = vld [vmem:[%s1716_s5] ss:$0 sm:$0xff] }
 0xc7c   :  { %v921_v53 = vadd.f32 %v1224_v46, %v920_v51 }
 0xc7e   :  { %v925_v55 = vsel %vm924_vm5, %v1224_v46, %v921_v53 }
 0xc7f   :  { %v930_v56 = vsel %vm927_vm6, %v929_v54, %v925_v55  ;;  %v1228_v23 = vpop.eup %1227 }
 0xc80   :  { %v932_v57 = vmul.f32 2.0, %v930_v56  ;;  %v903_v24 = vmul.f32 %v1228_v23, %v900_v20  ;;  %vm908_vm7 = vweird.f32 %v1228_v23  ;;  %v1051_v20 = vld [vmem:[#allocation9 + $0x8] sm:$0xff] }
 0xc81   :  { %vm909_vm10 = vmor %vm907_vm9, %vm908_vm7  ;;  %1081 = vmatpush.msra.mxu0 %v1051_v20 }
 0xc82   :  { %v1139_v58 = vadd.f32 -1.0, %v932_v57  ;;  %v904_v25 = vsub.f32 1.0, %v903_v24 }
 0xc84   :  { %936 = vrot.lane.b32.xlu1 %v1139_v58, %s1377_s3  ;;  %v905_v27 = vmul.f32 %v1228_v23, %v904_v25 }
 0xc86   :  { %v906_v29 = vadd.f32 %v1228_v23, %v905_v27 }
 0xc88   :  { %v910_v21 = vsel %vm909_vm10, %v1228_v23, %v906_v29  ;;  %v1050_v23 = vld [vmem:[#allocation9] sm:$0xff] }
 0xc89   :  { %v915_v34 = vsel %vm912_vm11, %v914_v32, %v910_v21  ;;  %1082 = vmatpush.msra.mxu0 %v1050_v23 }
 0xc8a   :  { %v934_v3 = vmul.f32 %v915_v34, %v1677_v19 }
 0xc8c   :  { %156 = vperm.xlu1 %1159, %v151_v60  }
 0xcf6   :  { %v937_v33 = vpop.permute.xlu1 %936 }
 0xcf7   :  { %v939_v2 = vmul.f32 %v937_v33, %v915_v34 }
 0xcf9   :  { %941 = vrot.lane.b32.xlu2 %v939_v2, %s1377_s3 }
 0xcfe   :  { %v157_v9 = vpop.permute.xlu1 %156 }
 0xcff   :  { %v178_v10 = vmul.f32 %v1541_v22, %v157_v9  ;;  %v177_v42 = vmul.f32 %v1551_v45, %v157_v9 }
 0xd01   :  { %v199_v11 = vadd.f32 %v1547_v26, %v178_v10  ;;  %v198_v44 = vadd.f32 %v1554_v47, %v177_v42 }
 0xd53   :  { %v942_v4 = vpop.permute.xlu2 %941 }
 0xd54   :  { %v1690_v5 = vadd.f32 %v942_v4, %v934_v3 }
 0xd56   :  { %1229 = vtanh.f32 %v1690_v5 }
 0xd5c   :  { %v1230_v6 = vpop.eup %1229 }
 0xd5d   :  { %947 = vrot.lane.b32.xlu0 %v1230_v6, %s1377_s3 }
 0xdcf   :  { %v948_v7 = vpop.permute.xlu0 %947 }
 0xdd0   :  { %v950_v8 = vmul.f32 %v948_v7, %v930_v56 }
 0xdd2   :  { %1140 = vmatmul.msk.f32.vlgmr.msrb.gmra.mxu2 %vm218_vm8, %v950_v8  ;;  %1141 = vmatmul.msk.f32.vlgmr.msrb.gmra.mxu3 %vm218_vm8, %v950_v8 }
 0xe55   :  { %v994_v12 = vpop.f32.mrf.mxu3  ;;  %v974_v43 = vpop.f32.mrf.mxu2 }
 0xe56   :  { %v998_v14 = vadd.f32 %v994_v12, %v199_v11  ;;  %v997_v46 = vadd.f32 %v974_v43, %v198_v44 }
 0xe58   :  { %v1143_v15 = vmul.f32 -1.442695, %v998_v14  ;;  %v1142_v48 = vmul.f32 -1.442695, %v997_v46 }
 0xe5a   :  { %1231 = vpow2.f32 %v1143_v15 }
 0xe60   :  { %v1232_v16 = vpop.eup %1231 }
 0xe61   :  { %v1006_v17 = vadd.f32 1.0, %v1232_v16 }
 0xe63   :  { %1233 = vrcp.f32 %v1006_v17  ;;  %v1033_v35 = vand.u32 2147483648, %v1006_v17  ;;  %v1031_v37 = vand.u32 2147483647, %v1006_v17  ;;  %vm1027_vm13 = vweird.f32 %v1006_v17 }
 0xe64   :  { %1235 = vpow2.f32 %v1142_v48 }
 0xe65   :  { %v1034_v22 = vor.u32 1.1754944e-38, %v1033_v35  ;;  %vm1032_vm15 = vcmp.eq.f32.partialorder %v1031_v37, 8.507059e+37 }
 0xe69   :  { %v1234_v18 = vpop.eup %1233 }
 0xe6a   :  { %v1023_v19 = vmul.f32 %v1234_v18, %v1006_v17  ;;  %vm1028_vm12 = vweird.f32 %v1234_v18  ;;  %v1236_v49 = vpop.eup %1235 }
 0xe6b   :  { %vm1029_vm14 = vmor %vm1027_vm13, %vm1028_vm12  ;;  %v1005_v50 = vadd.f32 1.0, %v1236_v49 }
 0xe6c   :  { %v1024_v28 = vsub.f32 1.0, %v1023_v19 }
 0xe6d   :  { %1237 = vrcp.f32 %v1005_v50  ;;  %v1018_v56 = vand.u32 2147483648, %v1005_v50  ;;  %vm1012_vm1 = vweird.f32 %v1005_v50  ;;  %v1016_v57 = vand.u32 2147483647, %v1005_v50 }
 0xe6e   :  { %v1025_v36 = vmul.f32 %v1234_v18, %v1024_v28 }
 0xe6f   :  { %v1019_v58 = vor.u32 1.1754944e-38, %v1018_v56  ;;  %vm1017_vm3 = vcmp.eq.f32.partialorder %v1016_v57, 8.507059e+37 }
 0xe70   :  { %v1026_v38 = vadd.f32 %v1234_v18, %v1025_v36 }
 0xe72   :  { %v1030_v39 = vsel %vm1029_vm14, %v1234_v18, %v1026_v38 }
 0xe73   :  { %v1035_v26 = vsel %vm1032_vm15, %v1034_v22, %v1030_v39  ;;  %v1238_v51 = vpop.eup %1237 }
 0xe74   :  { %v1037_v40 = vmul.f32 2.0, %v1035_v26  ;;  %v1008_v52 = vmul.f32 %v1238_v51, %v1005_v50  ;;  %vm1013_vm0 = vweird.f32 %v1238_v51 }
 0xe75   :  { %vm1014_vm2 = vmor %vm1012_vm1, %vm1013_vm0 }
 0xe76   :  { %v1144_v41 = vadd.f32 -1.0, %v1037_v40  ;;  %v1009_v53 = vsub.f32 1.0, %v1008_v52 }
 0xe78   :  { %1041 = vrot.lane.b32.xlu2 %v1144_v41, %s1377_s3  ;;  %v1010_v54 = vmul.f32 %v1238_v51, %v1009_v53 }
 0xe7a   :  { %v1011_v55 = vadd.f32 %v1238_v51, %v1010_v54 }
 0xe7c   :  { %v1015_v45 = vsel %vm1014_vm2, %v1238_v51, %v1011_v55 }
 0xe7d   :  { %v1020_v59 = vsel %vm1017_vm3, %v1019_v58, %v1015_v45 }
 0xe7e   :  { %v1039_v24 = vmul.f32 %v1020_v59, %v1690_v5 }
 0xed2   :  { %v1042_v47 = vpop.permute.xlu2 %1041 }
 0xed3   :  { %v1044_v60 = vmul.f32 %v1042_v47, %v1020_v59 }
 0xed5   :  { %1046 = vrot.lane.b32.xlu0 %v1044_v60, %s1377_s3 }
 0xf47   :  { %v1047_v25 = vpop.permute.xlu0 %1046 }
 0xf48   :  { %v1049_v27 = vadd.f32 %v1047_v25, %v1039_v24 }
 0xf4a   :  { %1063 = vrot.lane.b32.xlu1 %v1049_v27, %s1377_s3 }
 0xfbc   :  { %v1064_v29 = vpop.permute.xlu1 %1063 }
 0xfbd   :  { %1145 = vmatmul.msk.f32.vlgmr.msra.gmra.mxu0 %vm218_vm8, %v1064_v29 }
0x103a   :  { %v1084_v31 = vpop.f32.mrf.mxu0 }
0x103b   :  { %v1085_v21 = vadd.f32 %v1160_v30, %v1084_v31 }
0x103d   :  { %1087 = vst [vmem:[#allocation11] sm:$0xff] %v1085_v21 }
0x103e   :  { %1098 = dma.vmem_to_hbm [thread:$0]  %s1094_s22, 128, %s1096_s25, [#allocation5]  }
0x103f   :  { %1366 = dma.done.wait [#allocation5], 128  }
0x1040   :  { %1367 = vsyncadd [#allocation5], 4294967168 }
0x1041   :  { %1103 = vsyncpa [#allocation4], 1 }
0x1042   :  { %1104 = vsyncpa [#allocation7], 1 }
0x1043   :  { %1105 = vsyncpa [#allocation10], 1 }
0x1044   :  { %1106 = vsyncpa [#allocation5], 1 }

</bundles_post_ra>
